<compile_context>
chip_gen: v7x
topology: tpu7x:2x2x1
jax: 0.10.0
libtpu: 0.0.40
codegen_flags: <defaults>
</compile_context>

<pallas_src>
import functools

import jax
import jax.numpy as jnp
from jax.experimental import pallas as pl
from jax.experimental.pallas import tpu as pltpu

INPUT_DIM = 5
OUTPUT_DIM = 5
HIDDEN = 512
LANE = 128                 # pad narrow feature dims up to one full lane group
DEFAULT_BATCH_TILE = 128   # batch rows per grid step (capped to the padded batch)


def _round_up(x, m):
    return (x + m - 1) // m * m


def _mlp_kernel(x_ref, w1_ref, b1_ref, w2_ref, b2_ref,
                w3_ref, b3_ref, w4_ref, b4_ref, o_ref):
    f32 = jnp.float32
    bf16 = jnp.bfloat16

    def layer(h, w_ref, b_ref, relu):
        # bf16 x bf16 on the MXU, f32 accumulation; bias add / ReLU in f32.
        acc = jnp.dot(h.astype(bf16), w_ref[...], preferred_element_type=f32)
        acc = acc + b_ref[...].astype(f32)
        return jnp.maximum(acc, 0.0) if relu else acc

    h = x_ref[...]                       # (TB, 128) f32, zero-padded features
    h = layer(h, w1_ref, b1_ref, True)   # (TB, 512)
    h = layer(h, w2_ref, b2_ref, True)   # (TB, 512)
    h = layer(h, w3_ref, b3_ref, True)   # (TB, 512)
    h = layer(h, w4_ref, b4_ref, False)  # (TB, 128), cols >= OUTPUT_DIM are zero
    o_ref[...] = h.astype(o_ref.dtype)


def init_params(key):
    """PyTorch-style nn.Linear init U(-1/sqrt(fan_in), 1/sqrt(fan_in)), f32.

    Weights are stored as (in_features, out_features) so forward is x @ W + b,
    matching nn.Linear's x @ W.T + b."""
    dims = [(INPUT_DIM, HIDDEN), (HIDDEN, HIDDEN), (HIDDEN, HIDDEN), (HIDDEN, OUTPUT_DIM)]
    params = []
    for fan_in, fan_out in dims:
        key, kw, kb = jax.random.split(key, 3)
        bound = 1.0 / jnp.sqrt(fan_in)
        w = jax.random.uniform(kw, (fan_in, fan_out), jnp.float32, -bound, bound)
        b = jax.random.uniform(kb, (1, fan_out), jnp.float32, -bound, bound)
        params.append((w, b))
    return params


def prepare_params(params_f32):
    """Cast to bf16 and zero-pad the narrow feature dims (5) up to 128 lanes."""
    bf16 = jnp.bfloat16
    (w1, b1), (w2, b2), (w3, b3), (w4, b4) = params_f32
    w1p = jnp.zeros((LANE, HIDDEN), bf16).at[:INPUT_DIM, :].set(w1.astype(bf16))
    w4p = jnp.zeros((HIDDEN, LANE), bf16).at[:, :OUTPUT_DIM].set(w4.astype(bf16))
    b4p = jnp.zeros((1, LANE), bf16).at[:, :OUTPUT_DIM].set(b4.astype(bf16))
    return ((w1p, b1.astype(bf16)),
            (w2.astype(bf16), b2.astype(bf16)),
            (w3.astype(bf16), b3.astype(bf16)),
            (w4p, b4p))


def simple_net_forward(x, prepared_params, *, batch_tile=DEFAULT_BATCH_TILE):
    """Forward pass. `prepared_params` must come from prepare_params()."""
    (w1, b1), (w2, b2), (w3, b3), (w4, b4) = prepared_params
    B = x.shape[0]

    # Batch tile: multiple of 8 sublanes, capped to the (padded) batch size.
    tb = min(batch_tile, _round_up(B, 8))
    b_pad = _round_up(B, tb)

    # Zero-pad batch to a tile multiple and features to a full 128-lane block.
    x_p = jnp.zeros((b_pad, LANE), jnp.float32).at[:B, :INPUT_DIM].set(
        x.astype(jnp.float32))

    def const_spec(arr):
        return pl.BlockSpec(arr.shape, lambda i, _nd=arr.ndim: (0,) * _nd)

    out_p = pl.pallas_call(
        _mlp_kernel,
        out_shape=jax.ShapeDtypeStruct((b_pad, LANE), jnp.float32),
        grid=(b_pad // tb,),
        in_specs=[
            pl.BlockSpec((tb, LANE), lambda i: (i, 0)),   # x: streamed per batch tile
            const_spec(w1), const_spec(b1),               # weights: VMEM-resident
            const_spec(w2), const_spec(b2),
            const_spec(w3), const_spec(b3),
            const_spec(w4), const_spec(b4),
        ],
        out_specs=pl.BlockSpec((tb, LANE), lambda i: (i, 0)),
        compiler_params=pltpu.CompilerParams(
            dimension_semantics=("parallel",)),
    )(x_p, w1, b1, w2, b2, w3, b3, w4, b4)

    return out_p[:B, :OUTPUT_DIM]


def reference_forward(x, prepared_params):
    """Pure-JAX reference with identical numerics (bf16 operands, f32 accumulation)."""
    (w1, b1), (w2, b2), (w3, b3), (w4, b4) = prepared_params
    B = x.shape[0]
    h = jnp.zeros((B, LANE), jnp.float32).at[:, :INPUT_DIM].set(x.astype(jnp.float32))
    layers = ((w1, b1), (w2, b2), (w3, b3), (w4, b4))
    for i, (w, b) in enumerate(layers):
        h = jnp.dot(h.astype(jnp.bfloat16), w, preferred_element_type=jnp.float32)
        h = h + b.astype(jnp.float32)
        if i < len(layers) - 1:
            h = jnp.maximum(h, 0.0)
    return h[:, :OUTPUT_DIM]


if __name__ == "__main__":
    key = jax.random.PRNGKey(0)
    key, kx = jax.random.split(key)

    params = prepare_params(init_params(key))

    # Small single-tile case (B=8 -> one grid step).
    B = 8
    x = jax.random.normal(kx, (B, INPUT_DIM), jnp.float32)
    out = jax.block_until_ready(simple_net_forward(x, params))
    ref = reference_forward(x, params)
    assert out.shape == (B, OUTPUT_DIM)
    assert jnp.allclose(out, ref, atol=1e-3, rtol=1e-3), "mismatch vs reference (B=8)"

    # Multi-tile case to exercise the batch grid axis (B=40, tile=16 -> 3 grid steps).
    key, kx2 = jax.random.split(key)
    x2 = jax.random.normal(kx2, (40, INPUT_DIM), jnp.float32)
    out2 = jax.block_until_ready(simple_net_forward(x2, params, batch_tile=16))
    ref2 = reference_forward(x2, params)
    assert out2.shape == (40, OUTPUT_DIM)
    assert jnp.allclose(out2, ref2, atol=1e-3, rtol=1e-3), "mismatch vs reference (B=40)"

    print("KERNEL_OK")
</pallas_src>

<mosaic_0001>
module attributes {stable_mosaic.version = 11 : i64} {
  func.func @_mlp_kernel(%arg0: i32, %arg1: memref<8x128xf32, #tpu.memory_space<vmem>>, %arg2: memref<128x512xbf16, #tpu.memory_space<vmem>>, %arg3: memref<1x512xbf16, #tpu.memory_space<vmem>>, %arg4: memref<512x512xbf16, #tpu.memory_space<vmem>>, %arg5: memref<1x512xbf16, #tpu.memory_space<vmem>>, %arg6: memref<512x512xbf16, #tpu.memory_space<vmem>>, %arg7: memref<1x512xbf16, #tpu.memory_space<vmem>>, %arg8: memref<512x128xbf16, #tpu.memory_space<vmem>>, %arg9: memref<1x128xbf16, #tpu.memory_space<vmem>>, %arg10: memref<8x128xf32, #tpu.memory_space<vmem>>) attributes {dimension_semantics = [#tpu.dimension_semantics<parallel>], iteration_bounds = array<i64: 1>, scalar_prefetch = 0 : i64, scratch_operands = 0 : i64, tpu.core_type = #tpu.core_type<tc>, window_params = [{transform_indices = @transform_0, window_bounds = array<i64: 8, 128>}, {pipeline_mode = #tpu.pipeline_mode<synchronous>, transform_indices = @transform_1, window_bounds = array<i64: 128, 512>}, {pipeline_mode = #tpu.pipeline_mode<synchronous>, transform_indices = @transform_2, window_bounds = array<i64: 1, 512>}, {pipeline_mode = #tpu.pipeline_mode<synchronous>, transform_indices = @transform_3, window_bounds = array<i64: 512, 512>}, {pipeline_mode = #tpu.pipeline_mode<synchronous>, transform_indices = @transform_4, window_bounds = array<i64: 1, 512>}, {pipeline_mode = #tpu.pipeline_mode<synchronous>, transform_indices = @transform_5, window_bounds = array<i64: 512, 512>}, {pipeline_mode = #tpu.pipeline_mode<synchronous>, transform_indices = @transform_6, window_bounds = array<i64: 1, 512>}, {pipeline_mode = #tpu.pipeline_mode<synchronous>, transform_indices = @transform_7, window_bounds = array<i64: 512, 128>}, {pipeline_mode = #tpu.pipeline_mode<synchronous>, transform_indices = @transform_8, window_bounds = array<i64: 1, 128>}, {transform_indices = @transform_9, window_bounds = array<i64: 8, 128>}]} {
    %c0 = arith.constant 0 : index
    %c0_0 = arith.constant 0 : index
    %0 = vector.load %arg1[%c0, %c0_0] : memref<8x128xf32, #tpu.memory_space<vmem>>, vector<8x128xf32>
    %1 = arith.truncf %0 : vector<8x128xf32> to vector<8x128xbf16>
    %c0_1 = arith.constant 0 : index
    %c0_2 = arith.constant 0 : index
    %2 = vector.load %arg2[%c0_1, %c0_2] : memref<128x512xbf16, #tpu.memory_space<vmem>>, vector<128x512xbf16>
    %cst = arith.constant dense<0.000000e+00> : vector<8x512xf32>
    %3 = tpu.matmul %1, %2, %cst {dimension_numbers = #tpu.dot_dimension_numbers<[1], [0], [0], [1], [0, 0, 1, 1], [], []>} : vector<8x128xbf16>, vector<128x512xbf16>, vector<8x512xf32> -> vector<8x512xf32>
    %c0_3 = arith.constant 0 : index
    %c0_4 = arith.constant 0 : index
    %4 = vector.load %arg3[%c0_3, %c0_4] : memref<1x512xbf16, #tpu.memory_space<vmem>>, vector<1x512xbf16>
    %5 = arith.extf %4 : vector<1x512xbf16> to vector<1x512xf32>
    %6 = vector.broadcast %5 : vector<1x512xf32> to vector<8x512xf32>
    %7 = arith.addf %3, %6 : vector<8x512xf32>
    %cst_5 = arith.constant 0.000000e+00 : f32
    %8 = vector.broadcast %cst_5 : f32 to vector<8x512xf32>
    %9 = arith.maximumf %7, %8 : vector<8x512xf32>
    %10 = arith.truncf %9 : vector<8x512xf32> to vector<8x512xbf16>
    %c0_6 = arith.constant 0 : index
    %c0_7 = arith.constant 0 : index
    %11 = vector.load %arg4[%c0_6, %c0_7] : memref<512x512xbf16, #tpu.memory_space<vmem>>, vector<512x512xbf16>
    %cst_8 = arith.constant dense<0.000000e+00> : vector<8x512xf32>
    %12 = tpu.matmul %10, %11, %cst_8 {dimension_numbers = #tpu.dot_dimension_numbers<[1], [0], [0], [1], [0, 0, 1, 1], [], []>} : vector<8x512xbf16>, vector<512x512xbf16>, vector<8x512xf32> -> vector<8x512xf32>
    %c0_9 = arith.constant 0 : index
    %c0_10 = arith.constant 0 : index
    %13 = vector.load %arg5[%c0_9, %c0_10] : memref<1x512xbf16, #tpu.memory_space<vmem>>, vector<1x512xbf16>
    %14 = arith.extf %13 : vector<1x512xbf16> to vector<1x512xf32>
    %15 = vector.broadcast %14 : vector<1x512xf32> to vector<8x512xf32>
    %16 = arith.addf %12, %15 : vector<8x512xf32>
    %cst_11 = arith.constant 0.000000e+00 : f32
    %17 = vector.broadcast %cst_11 : f32 to vector<8x512xf32>
    %18 = arith.maximumf %16, %17 : vector<8x512xf32>
    %19 = arith.truncf %18 : vector<8x512xf32> to vector<8x512xbf16>
    %c0_12 = arith.constant 0 : index
    %c0_13 = arith.constant 0 : index
    %20 = vector.load %arg6[%c0_12, %c0_13] : memref<512x512xbf16, #tpu.memory_space<vmem>>, vector<512x512xbf16>
    %cst_14 = arith.constant dense<0.000000e+00> : vector<8x512xf32>
    %21 = tpu.matmul %19, %20, %cst_14 {dimension_numbers = #tpu.dot_dimension_numbers<[1], [0], [0], [1], [0, 0, 1, 1], [], []>} : vector<8x512xbf16>, vector<512x512xbf16>, vector<8x512xf32> -> vector<8x512xf32>
    %c0_15 = arith.constant 0 : index
    %c0_16 = arith.constant 0 : index
    %22 = vector.load %arg7[%c0_15, %c0_16] : memref<1x512xbf16, #tpu.memory_space<vmem>>, vector<1x512xbf16>
    %23 = arith.extf %22 : vector<1x512xbf16> to vector<1x512xf32>
    %24 = vector.broadcast %23 : vector<1x512xf32> to vector<8x512xf32>
    %25 = arith.addf %21, %24 : vector<8x512xf32>
    %cst_17 = arith.constant 0.000000e+00 : f32
    %26 = vector.broadcast %cst_17 : f32 to vector<8x512xf32>
    %27 = arith.maximumf %25, %26 : vector<8x512xf32>
    %28 = arith.truncf %27 : vector<8x512xf32> to vector<8x512xbf16>
    %c0_18 = arith.constant 0 : index
    %c0_19 = arith.constant 0 : index
    %29 = vector.load %arg8[%c0_18, %c0_19] : memref<512x128xbf16, #tpu.memory_space<vmem>>, vector<512x128xbf16>
    %cst_20 = arith.constant dense<0.000000e+00> : vector<8x128xf32>
    %30 = tpu.matmul %28, %29, %cst_20 {dimension_numbers = #tpu.dot_dimension_numbers<[1], [0], [0], [1], [0, 0, 1, 1], [], []>} : vector<8x512xbf16>, vector<512x128xbf16>, vector<8x128xf32> -> vector<8x128xf32>
    %c0_21 = arith.constant 0 : index
    %c0_22 = arith.constant 0 : index
    %31 = vector.load %arg9[%c0_21, %c0_22] : memref<1x128xbf16, #tpu.memory_space<vmem>>, vector<1x128xbf16>
    %32 = arith.extf %31 : vector<1x128xbf16> to vector<1x128xf32>
    %33 = vector.broadcast %32 : vector<1x128xf32> to vector<8x128xf32>
    %34 = arith.addf %30, %33 : vector<8x128xf32>
    %c0_23 = arith.constant 0 : index
    %c0_24 = arith.constant 0 : index
    %35 = vector.load %arg10[%c0_23, %c0_24] : memref<8x128xf32, #tpu.memory_space<vmem>>, vector<8x128xf32>
    tpu.vector_store %arg10[%c0_23, %c0_24], %34 {strides = array<i32>} : memref<8x128xf32, #tpu.memory_space<vmem>>, vector<8x128xf32>,
    return
  }
  func.func @transform_0(%arg0: i32) -> (i32, i32) {
    %c0_i32 = arith.constant 0 : i32
    %c0_i32_0 = arith.constant 0 : i32
    return %arg0, %c0_i32 : i32, i32
  }
  func.func @transform_1(%arg0: i32) -> (i32, i32) {
    %c0_i32 = arith.constant 0 : i32
    %c0_i32_0 = arith.constant 0 : i32
    %c0_i32_1 = arith.constant 0 : i32
    return %c0_i32, %c0_i32_0 : i32, i32
  }
  func.func @transform_2(%arg0: i32) -> (i32, i32) {
    %c0_i32 = arith.constant 0 : i32
    %c0_i32_0 = arith.constant 0 : i32
    %c0_i32_1 = arith.constant 0 : i32
    return %c0_i32, %c0_i32_0 : i32, i32
  }
  func.func @transform_3(%arg0: i32) -> (i32, i32) {
    %c0_i32 = arith.constant 0 : i32
    %c0_i32_0 = arith.constant 0 : i32
    %c0_i32_1 = arith.constant 0 : i32
    return %c0_i32, %c0_i32_0 : i32, i32
  }
  func.func @transform_4(%arg0: i32) -> (i32, i32) {
    %c0_i32 = arith.constant 0 : i32
    %c0_i32_0 = arith.constant 0 : i32
    %c0_i32_1 = arith.constant 0 : i32
    return %c0_i32, %c0_i32_0 : i32, i32
  }
  func.func @transform_5(%arg0: i32) -> (i32, i32) {
    %c0_i32 = arith.constant 0 : i32
    %c0_i32_0 = arith.constant 0 : i32
    %c0_i32_1 = arith.constant 0 : i32
    return %c0_i32, %c0_i32_0 : i32, i32
  }
  func.func @transform_6(%arg0: i32) -> (i32, i32) {
    %c0_i32 = arith.constant 0 : i32
    %c0_i32_0 = arith.constant 0 : i32
    %c0_i32_1 = arith.constant 0 : i32
    return %c0_i32, %c0_i32_0 : i32, i32
  }
  func.func @transform_7(%arg0: i32) -> (i32, i32) {
    %c0_i32 = arith.constant 0 : i32
    %c0_i32_0 = arith.constant 0 : i32
    %c0_i32_1 = arith.constant 0 : i32
    return %c0_i32, %c0_i32_0 : i32, i32
  }
  func.func @transform_8(%arg0: i32) -> (i32, i32) {
    %c0_i32 = arith.constant 0 : i32
    %c0_i32_0 = arith.constant 0 : i32
    %c0_i32_1 = arith.constant 0 : i32
    return %c0_i32, %c0_i32_0 : i32, i32
  }
  func.func @transform_9(%arg0: i32) -> (i32, i32) {
    %c0_i32 = arith.constant 0 : i32
    %c0_i32_0 = arith.constant 0 : i32
    return %arg0, %c0_i32 : i32, i32
  }
}

</mosaic_0001>

<bundles_post_ra>
// kernel: tpu_custom_call.1
= control target key start
LH: loop header
LB: loop body
LE: loop exit
PB: predicated region body
PF: predicated region fallthrough
CT: control target
= control target key end

     0   :  { %14 = vsyncpa [#allocation3], 0  ;;  %s3955_s0 = inlined_call_operand.hbm [shape: f32[8,128], index: 0, kind: input, shape index: {}]   ;;  %s3956_s1 = inlined_call_operand.hbm [shape: bf16[128,512], index: 1, kind: input, shape index: {}]   ;;  %s3957_s2 = inlined_call_operand.vmem [shape: bf16[1,512], index: 2, kind: input, shape index: {}]   ;;  %s3958_s3 = inlined_call_operand.hbm [shape: bf16[512,512], index: 3, kind: input, shape index: {}]   ;;  %s3959_s4 = inlined_call_operand.vmem [shape: bf16[1,512], index: 4, kind: input, shape index: {}]   ;;  %s3960_s5 = inlined_call_operand.hbm [shape: bf16[512,512], index: 5, kind: input, shape index: {}]   ;;  %s3961_s6 = inlined_call_operand.vmem [shape: bf16[1,512], index: 6, kind: input, shape index: {}]   ;;  %s3962_s7 = inlined_call_operand.hbm [shape: bf16[512,128], index: 7, kind: input, shape index: {}]   ;;  %s3963_s8 = inlined_call_operand.vmem [shape: bf16[1,128], index: 8, kind: input, shape index: {}]   ;;  %s3964_s9 = inlined_call_operand.hbm [shape: f32[8,128], index: 9, kind: output, shape index: {}]  }
   0x1   :  { %15 = vsyncpa [#allocation6], 0 }
   0x2   :  { %16 = vsyncpa [#allocation9], 0 }
   0x3   :  { %17 = vsyncpa [#allocation4], 0  ;;  %s3744_s30 = smov [#allocation5]   ;;  %s3604_s13 = scalar_lea.hbm %s3956_s1, 4096 }
   0x4   :  { %s33_s10 = sshll.u32 %s3744_s30, 4  ;;  %p3605_p0 = scmp.ne.s32.totalorder %s3956_s1, %s3604_s13  ;;  %s34_s10 = int_to_ptr.vmem [resolvable:$true] %s33_s10 }
   0x5   :  { %p3608_p1 = scmp.lt.u32.totalorder %s3604_s13, %s3956_s1 }
   0x7   :  { %p3610_p2 = pnand %p3608_p1, %p3605_p0 }
   0x9   :  { %3613 = shalt.err (!%p3610_p2)
}
   0xa   :  { %s3614_s18 = scalar_lea.vmem %s34_s10, 4096  ;;  %p3619_p4 = scmp.lt.s32.totalorder %s34_s10, %s34_s10 }
   0xb   :  { %p3615_p3 = scmp.ne.s32.totalorder %s34_s10, %s3614_s18  ;;  %p3620_p5 = scmp.lt.s32.totalorder %s3614_s18, %s3614_s18 }
   0xd   :  { %p3621_p6 = por %p3620_p5, %p3619_p4 }
   0xf   :  { %p3622_p7 = pnand %p3621_p6, %p3615_p3 }
  0x11   :  { %3625 = shalt.err (!%p3622_p7)
}
  0x12   :  { %s3745_s19 = smov 256   ;;  %s3746_s20 = smov 16  }
  0x13   :  { %39 = dma.hbm_to_vmem [thread:$0]  %s3956_s1, 4096, %s34_s10, [#allocation6], %s3745_s19, %s3745_s19, %s3746_s20  }
  0x14   :  { %s3747_s23 = smov [#allocation8]   ;;  %s3748_s25 = smov [#allocation2]  }
  0x15   :  { %s61_s24 = sshll.u32 %s3747_s23, 4  ;;  %s24_s26 = sshll.u32 %s3748_s25, 4  ;;  %s62_s24 = int_to_ptr.vmem [resolvable:$true] %s61_s24  ;;  %s25_s26 = int_to_ptr.vmem [resolvable:$true] %s24_s26 }
  0x16   :  { %s3626_s29 = scalar_lea.hbm %s3960_s5, 16384 }
  0x17   :  { %p3627_p8 = scmp.ne.s32.totalorder %s3960_s5, %s3626_s29  ;;  %p3630_p9 = scmp.lt.u32.totalorder %s3626_s29, %s3960_s5 }
  0x19   :  { %p3632_p10 = pnand %p3630_p9, %p3627_p8 }
  0x1b   :  { %3635 = shalt.err (!%p3632_p10)
}
  0x1c   :  { %s3636_s1 = scalar_lea.vmem %s62_s24, 16384  ;;  %p3641_p12 = scmp.lt.s32.totalorder %s62_s24, %s62_s24 }
  0x1d   :  { %p3637_p11 = scmp.ne.s32.totalorder %s62_s24, %s3636_s1  ;;  %p3642_p13 = scmp.lt.s32.totalorder %s3636_s1, %s3636_s1 }
  0x1f   :  { %p3643_p0 = por %p3642_p13, %p3641_p12 }
  0x21   :  { %p3644_p1 = pnand %p3643_p0, %p3637_p11 }
  0x23   :  { %3647 = shalt.err (!%p3644_p1)
}
  0x24   :  { %67 = dma.hbm_to_vmem [thread:$0]  %s3960_s5, 16384, %s62_s24, [#allocation9], %s3745_s19, %s3745_s19, %s3746_s20  }
  0x25   :  { %s3648_s17 = scalar_lea.hbm %s3955_s0, 128 }
  0x26   :  { %p3649_p2 = scmp.ne.s32.totalorder %s3955_s0, %s3648_s17  ;;  %p3652_p3 = scmp.lt.u32.totalorder %s3648_s17, %s3955_s0 }
  0x28   :  { %p3654_p4 = pnand %p3652_p3, %p3649_p2 }
  0x2a   :  { %3657 = shalt.err (!%p3654_p4)
}
  0x2b   :  { %s3658_s25 = scalar_lea.vmem %s25_s26, 128  ;;  %p3663_p6 = scmp.lt.s32.totalorder %s25_s26, %s25_s26 }
  0x2c   :  { %p3659_p5 = scmp.ne.s32.totalorder %s25_s26, %s3658_s25  ;;  %p3664_p7 = scmp.lt.s32.totalorder %s3658_s25, %s3658_s25 }
  0x2e   :  { %p3665_p8 = por %p3664_p7, %p3663_p6 }
  0x30   :  { %p3666_p9 = pnand %p3665_p8, %p3659_p5 }
  0x32   :  { %3669 = shalt.err (!%p3666_p9)
}
  0x33   :  { %27 = dma.hbm_to_vmem [thread:$0]  %s3955_s0, 128, %s25_s26, [#allocation3]  }
  0x34   :  { %s3749_s27 = smov [#allocation7]   ;;  %s3750_s29 = smov [#allocation10]  }
  0x35   :  { %s47_s28 = sshll.u32 %s3749_s27, 4  ;;  %s75_s30 = sshll.u32 %s3750_s29, 4  ;;  %s48_s28 = int_to_ptr.vmem [resolvable:$true] %s47_s28  ;;  %s76_s30 = int_to_ptr.vmem [resolvable:$true] %s75_s30 }
  0x36   :  { %s3670_s13 = scalar_lea.hbm %s3958_s3, 16384 }
  0x37   :  { %p3671_p10 = scmp.ne.s32.totalorder %s3958_s3, %s3670_s13  ;;  %p3674_p11 = scmp.lt.u32.totalorder %s3670_s13, %s3958_s3 }
  0x39   :  { %p3676_p12 = pnand %p3674_p11, %p3671_p10 }
  0x3b   :  { %3679 = shalt.err (!%p3676_p12)
}
  0x3c   :  { %s3680_s0 = scalar_lea.vmem %s48_s28, 16384  ;;  %p3685_p0 = scmp.lt.s32.totalorder %s48_s28, %s48_s28 }
  0x3d   :  { %p3681_p13 = scmp.ne.s32.totalorder %s48_s28, %s3680_s0  ;;  %p3686_p1 = scmp.lt.s32.totalorder %s3680_s0, %s3680_s0 }
  0x3f   :  { %p3687_p2 = por %p3686_p1, %p3685_p0 }
  0x41   :  { %p3688_p3 = pnand %p3687_p2, %p3681_p13 }
  0x43   :  { %3691 = shalt.err (!%p3688_p3)
}
  0x44   :  { %53 = dma.hbm_to_vmem [thread:$0]  %s3958_s3, 16384, %s48_s28, [#allocation6], %s3745_s19, %s3745_s19, %s3746_s20  }
  0x45   :  { %s3692_s21 = scalar_lea.hbm %s3962_s7, 4096 }
  0x46   :  { %p3693_p4 = scmp.ne.s32.totalorder %s3962_s7, %s3692_s21  ;;  %p3696_p5 = scmp.lt.u32.totalorder %s3692_s21, %s3962_s7 }
  0x48   :  { %p3698_p6 = pnand %p3696_p5, %p3693_p4 }
  0x4a   :  { %3701 = shalt.err (!%p3698_p6)
}
  0x4b   :  { %s3702_s24 = scalar_lea.vmem %s76_s30, 4096  ;;  %p3707_p8 = scmp.lt.s32.totalorder %s76_s30, %s76_s30 }
  0x4c   :  { %p3703_p7 = scmp.ne.s32.totalorder %s76_s30, %s3702_s24  ;;  %p3708_p9 = scmp.lt.s32.totalorder %s3702_s24, %s3702_s24 }
  0x4e   :  { %p3709_p10 = por %p3708_p9, %p3707_p8 }
  0x50   :  { %p3710_p11 = pnand %p3709_p10, %p3703_p7 }
  0x52   :  { %3713 = shalt.err (!%p3710_p11)
}
  0x53   :  { %s3751_s3 = smov 64   ;;  %s3752_s19 = smov 4  }
  0x54   :  { %81 = dma.hbm_to_vmem [thread:$0]  %s3962_s7, 4096, %s76_s30, [#allocation9], %s3751_s3, %s3751_s3, %s3752_s19  }
  0x55   :  { %3736 = dma.done.wait [#allocation3], 128  }
  0x56   :  { %3737 = vsyncadd [#allocation3], 4294967168 }
  0x57   :  { %3738 = dma.done.wait [#allocation6], 20480  }
  0x58   :  { %3739 = vsyncadd [#allocation6], 4294946816 }
  0x59   :  { %3740 = dma.done.wait [#allocation9], 20480  }
  0x5a   :  { %3741 = vsyncadd [#allocation9], 4294946816  ;;  %v3753_v0 = vmov 0   ;;  %v3140_v1 = vld [vmem:[#allocation5 + $0x4] ss:$16 sps:$4 sm:$0xff]   ;;  %v100_v26 = vld [vmem:[#allocation2] sm:$0xff] }
  0x5b   :  { %365 = vmatprep.mubr.bf16.mxu0 %v3753_v0  ;;  %406 = vmatprep.mubr.bf16.mxu1 %v3753_v0  ;;  %v3142_v2 = vld [vmem:[#allocation5] ss:$16 sps:$4 sm:$0xff]   ;;  %v3143_v3 = vld [vmem:[#allocation5 + $0x24] ss:$16 sps:$4 sm:$0xff]   ;;  %v3164_v10 = vld [vmem:[#allocation5 + $0xc] ss:$16 sps:$4 sm:$0xff]   ;;  %v101_v30 = vpack.c.bf16 %v100_v26, %v100_v26 }
  0x5c   :  { %333 = vmatprep.subr.bf16.mxu0 %v3140_v1  ;;  %v3145_v4 = vld [vmem:[#allocation5 + $0x20] ss:$16 sps:$4 sm:$0xff]   ;;  %v3146_v5 = vld [vmem:[#allocation5 + $0x44] ss:$16 sps:$4 sm:$0xff]   ;;  %v3166_v11 = vld [vmem:[#allocation5 + $0x8] ss:$16 sps:$4 sm:$0xff]   ;;  %374 = vmatprep.subr.bf16.mxu1 %v3164_v10 }
  0x5d   :  { %334 = vmatpush1.bf16.msra.mxu0 %v3142_v2  ;;  %v3148_v6 = vld [vmem:[#allocation5 + $0x40] ss:$16 sps:$4 sm:$0xff]   ;;  %v3149_v7 = vld [vmem:[#allocation5 + $0x64] ss:$16 sps:$4 sm:$0xff]   ;;  %v3167_v12 = vld [vmem:[#allocation5 + $0x2c] ss:$16 sps:$4 sm:$0xff]   ;;  %375 = vmatpush1.bf16.msra.mxu1 %v3166_v11 }
  0x5e   :  { %335 = vmatprep.subr.bf16.mxu0 %v3143_v3  ;;  %v3151_v8 = vld [vmem:[#allocation5 + $0x60] ss:$16 sps:$4 sm:$0xff]   ;;  %v3152_v9 = vld [vmem:[#allocation5 + $0x84] ss:$16 sps:$4 sm:$0xff]   ;;  %v3169_v14 = vld [vmem:[#allocation5 + $0x28] ss:$16 sps:$4 sm:$0xff]   ;;  %376 = vmatprep.subr.bf16.mxu1 %v3167_v12 }
  0x5f   :  { %v3154_v13 = vld [vmem:[#allocation5 + $0x80] ss:$16 sps:$4 sm:$0xff]   ;;  %v3170_v15 = vld [vmem:[#allocation5 + $0x4c] ss:$16 sps:$4 sm:$0xff]   ;;  %v3155_v16 = vld [vmem:[#allocation5 + $0xa4] ss:$16 sps:$4 sm:$0xff]  }
  0x60   :  { %v3157_v17 = vld [vmem:[#allocation5 + $0xa0] ss:$16 sps:$4 sm:$0xff]   ;;  %v3172_v18 = vld [vmem:[#allocation5 + $0x48] ss:$16 sps:$4 sm:$0xff]   ;;  %v3173_v19 = vld [vmem:[#allocation5 + $0x6c] ss:$16 sps:$4 sm:$0xff]  }
  0x61   :  { %336 = vmatpush1.bf16.msra.mxu0 %v3145_v4  ;;  %377 = vmatpush1.bf16.msra.mxu1 %v3169_v14  ;;  %v3158_v20 = vld [vmem:[#allocation5 + $0xc4] ss:$16 sps:$4 sm:$0xff]   ;;  %v3160_v21 = vld [vmem:[#allocation5 + $0xc0] ss:$16 sps:$4 sm:$0xff]   ;;  %v3175_v22 = vld [vmem:[#allocation5 + $0x68] ss:$16 sps:$4 sm:$0xff]  }
  0x62   :  { %337 = vmatprep.subr.bf16.mxu0 %v3146_v5  ;;  %378 = vmatprep.subr.bf16.mxu1 %v3170_v15  ;;  %v3176_v23 = vld [vmem:[#allocation5 + $0x8c] ss:$16 sps:$4 sm:$0xff]   ;;  %v3161_v24 = vld [vmem:[#allocation5 + $0xe4] ss:$16 sps:$4 sm:$0xff]   ;;  %v3163_v25 = vld [vmem:[#allocation5 + $0xe0] ss:$16 sps:$4 sm:$0xff]  }
  0x63   :  { %v3178_v27 = vld [vmem:[#allocation5 + $0x88] ss:$16 sps:$4 sm:$0xff]   ;;  %v3179_v28 = vld [vmem:[#allocation5 + $0xac] ss:$16 sps:$4 sm:$0xff]   ;;  %v3190_v29 = vld [vmem:[#allocation7 + $0x4] ss:$16 sps:$4 sm:$0xff]  }
  0x64   :  { %v3181_v31 = vld [vmem:[#allocation5 + $0xa8] ss:$16 sps:$4 sm:$0xff]   ;;  %v3182_v32 = vld [vmem:[#allocation5 + $0xcc] ss:$16 sps:$4 sm:$0xff]   ;;  %v3188_v33 = vld [vmem:[#allocation7] ss:$16 sps:$4 sm:$0xff]  }
  0x65   :  { %338 = vmatpush1.bf16.msra.mxu0 %v3148_v6  ;;  %379 = vmatpush1.bf16.msra.mxu1 %v3172_v18  ;;  %v3196_v34 = vld [vmem:[#allocation7 + $0x24] ss:$16 sps:$4 sm:$0xff]   ;;  %v3184_v35 = vld [vmem:[#allocation5 + $0xc8] ss:$16 sps:$4 sm:$0xff]   ;;  %v3185_v36 = vld [vmem:[#allocation5 + $0xec] ss:$16 sps:$4 sm:$0xff]  }
  0x66   :  { %339 = vmatprep.subr.bf16.mxu0 %v3149_v7  ;;  %380 = vmatprep.subr.bf16.mxu1 %v3173_v19  ;;  %v3194_v37 = vld [vmem:[#allocation7 + $0x20] ss:$16 sps:$4 sm:$0xff]   ;;  %v3202_v38 = vld [vmem:[#allocation7 + $0x44] ss:$16 sps:$4 sm:$0xff]   ;;  %v3187_v39 = vld [vmem:[#allocation5 + $0xe8] ss:$16 sps:$4 sm:$0xff]  }
  0x67   :  { %v3193_v40 = vld [vmem:[#allocation7 + $0xc] ss:$16 sps:$4 sm:$0xff]   ;;  %v3200_v41 = vld [vmem:[#allocation7 + $0x40] ss:$16 sps:$4 sm:$0xff]   ;;  %v3208_v42 = vld [vmem:[#allocation7 + $0x64] ss:$16 sps:$4 sm:$0xff]  }
  0x68   :  { %v3191_v43 = vld [vmem:[#allocation7 + $0x8] ss:$16 sps:$4 sm:$0xff]   ;;  %v3199_v44 = vld [vmem:[#allocation7 + $0x2c] ss:$16 sps:$4 sm:$0xff]   ;;  %v3206_v45 = vld [vmem:[#allocation7 + $0x60] ss:$16 sps:$4 sm:$0xff]  }
  0x69   :  { %340 = vmatpush1.bf16.msra.mxu0 %v3151_v8  ;;  %381 = vmatpush1.bf16.msra.mxu1 %v3175_v22  ;;  %v3214_v46 = vld [vmem:[#allocation7 + $0x84] ss:$16 sps:$4 sm:$0xff]   ;;  %v3197_v47 = vld [vmem:[#allocation7 + $0x28] ss:$16 sps:$4 sm:$0xff]   ;;  %v3205_v48 = vld [vmem:[#allocation7 + $0x4c] ss:$16 sps:$4 sm:$0xff]  }
  0x6a   :  { %341 = vmatprep.subr.bf16.mxu0 %v3152_v9  ;;  %382 = vmatprep.subr.bf16.mxu1 %v3176_v23  ;;  %v3212_v49 = vld [vmem:[#allocation7 + $0x80] ss:$16 sps:$4 sm:$0xff]   ;;  %v3220_v50 = vld [vmem:[#allocation7 + $0xa4] ss:$16 sps:$4 sm:$0xff]   ;;  %v3203_v51 = vld [vmem:[#allocation7 + $0x48] ss:$16 sps:$4 sm:$0xff]  }
  0x6b   :  { %v3211_v52 = vld [vmem:[#allocation7 + $0x6c] ss:$16 sps:$4 sm:$0xff]   ;;  %v3218_v53 = vld [vmem:[#allocation7 + $0xa0] ss:$16 sps:$4 sm:$0xff]   ;;  %v3226_v54 = vld [vmem:[#allocation7 + $0xc4] ss:$16 sps:$4 sm:$0xff]  }
  0x6c   :  { %v3209_v55 = vld [vmem:[#allocation7 + $0x68] ss:$16 sps:$4 sm:$0xff]   ;;  %v3217_v56 = vld [vmem:[#allocation7 + $0x8c] ss:$16 sps:$4 sm:$0xff]   ;;  %v3224_v57 = vld [vmem:[#allocation7 + $0xc0] ss:$16 sps:$4 sm:$0xff]  }
  0x6d   :  { %342 = vmatpush1.bf16.msra.mxu0 %v3154_v13  ;;  %383 = vmatpush1.bf16.msra.mxu1 %v3178_v27  ;;  %v3232_v58 = vld [vmem:[#allocation7 + $0xe4] ss:$16 sps:$4 sm:$0xff]   ;;  %v3215_v59 = vld [vmem:[#allocation7 + $0x88] ss:$16 sps:$4 sm:$0xff]   ;;  %v3223_v60 = vld [vmem:[#allocation7 + $0xac] ss:$16 sps:$4 sm:$0xff]  }
  0x6e   :  { %343 = vmatprep.subr.bf16.mxu0 %v3155_v16  ;;  %384 = vmatprep.subr.bf16.mxu1 %v3179_v28  ;;  %v3230_v61 = vld [vmem:[#allocation7 + $0xe0] ss:$16 sps:$4 sm:$0xff]   ;;  %v3238_v62 = vld [vmem:[#allocation7 + $0x104] ss:$16 sps:$4 sm:$0xff]   ;;  %v3221_v63 = vld [vmem:[#allocation7 + $0xa8] ss:$16 sps:$4 sm:$0xff]  }
  0x6f   :  { %v3229_v0 = vld [vmem:[#allocation7 + $0xcc] ss:$16 sps:$4 sm:$0xff]   ;;  %v3236_v1 = vld [vmem:[#allocation7 + $0x100] ss:$16 sps:$4 sm:$0xff]   ;;  %v3244_v2 = vld [vmem:[#allocation7 + $0x124] ss:$16 sps:$4 sm:$0xff]  }
  0x70   :  { %v3227_v3 = vld [vmem:[#allocation7 + $0xc8] ss:$16 sps:$4 sm:$0xff]   ;;  %v3235_v4 = vld [vmem:[#allocation7 + $0xec] ss:$16 sps:$4 sm:$0xff]   ;;  %v3242_v5 = vld [vmem:[#allocation7 + $0x120] ss:$16 sps:$4 sm:$0xff]  }
  0x71   :  { %344 = vmatpush1.bf16.msra.mxu0 %v3157_v17  ;;  %385 = vmatpush1.bf16.msra.mxu1 %v3181_v31  ;;  %v3250_v6 = vld [vmem:[#allocation7 + $0x144] ss:$16 sps:$4 sm:$0xff]   ;;  %v3233_v7 = vld [vmem:[#allocation7 + $0xe8] ss:$16 sps:$4 sm:$0xff]   ;;  %v3241_v8 = vld [vmem:[#allocation7 + $0x10c] ss:$16 sps:$4 sm:$0xff]  }
  0x72   :  { %345 = vmatprep.subr.bf16.mxu0 %v3158_v20  ;;  %386 = vmatprep.subr.bf16.mxu1 %v3182_v32  ;;  %v3248_v9 = vld [vmem:[#allocation7 + $0x140] ss:$16 sps:$4 sm:$0xff]   ;;  %v3256_v10 = vld [vmem:[#allocation7 + $0x164] ss:$16 sps:$4 sm:$0xff]   ;;  %v3239_v11 = vld [vmem:[#allocation7 + $0x108] ss:$16 sps:$4 sm:$0xff]  }
  0x73   :  { %v3247_v12 = vld [vmem:[#allocation7 + $0x12c] ss:$16 sps:$4 sm:$0xff]   ;;  %v3254_v13 = vld [vmem:[#allocation7 + $0x160] ss:$16 sps:$4 sm:$0xff]   ;;  %v3262_v14 = vld [vmem:[#allocation7 + $0x184] ss:$16 sps:$4 sm:$0xff]  }
  0x74   :  { %v3245_v15 = vld [vmem:[#allocation7 + $0x128] ss:$16 sps:$4 sm:$0xff]   ;;  %v3253_v16 = vld [vmem:[#allocation7 + $0x14c] ss:$16 sps:$4 sm:$0xff]   ;;  %v3260_v17 = vld [vmem:[#allocation7 + $0x180] ss:$16 sps:$4 sm:$0xff]  }
  0x75   :  { %346 = vmatpush1.bf16.msra.mxu0 %v3160_v21  ;;  %387 = vmatpush1.bf16.msra.mxu1 %v3184_v35  ;;  %v3268_v18 = vld [vmem:[#allocation7 + $0x1a4] ss:$16 sps:$4 sm:$0xff]   ;;  %v3251_v19 = vld [vmem:[#allocation7 + $0x148] ss:$16 sps:$4 sm:$0xff]   ;;  %v3259_v20 = vld [vmem:[#allocation7 + $0x16c] ss:$16 sps:$4 sm:$0xff]  }
  0x76   :  { %347 = vmatprep.subr.bf16.mxu0 %v3161_v24  ;;  %388 = vmatprep.subr.bf16.mxu1 %v3185_v36  ;;  %v3266_v21 = vld [vmem:[#allocation7 + $0x1a0] ss:$16 sps:$4 sm:$0xff]   ;;  %v3257_v22 = vld [vmem:[#allocation7 + $0x168] ss:$16 sps:$4 sm:$0xff]   ;;  %v3265_v23 = vld [vmem:[#allocation7 + $0x18c] ss:$16 sps:$4 sm:$0xff]  }
  0x77   :  { %v3263_v24 = vld [vmem:[#allocation7 + $0x188] ss:$16 sps:$4 sm:$0xff]   ;;  %v3274_v27 = vld [vmem:[#allocation7 + $0x1c4] ss:$16 sps:$4 sm:$0xff]   ;;  %v3277_v28 = vld [vmem:[#allocation7 + $0x1cc] ss:$16 sps:$4 sm:$0xff]  }
  0x78   :  { %v3269_v26 = vld [vmem:[#allocation7 + $0x1a8] ss:$16 sps:$4 sm:$0xff]   ;;  %v3280_v31 = vld [vmem:[#allocation7 + $0x1e4] ss:$16 sps:$4 sm:$0xff]   ;;  %v3283_v32 = vld [vmem:[#allocation7 + $0x1ec] ss:$16 sps:$4 sm:$0xff]  }
  0x79   :  { %348 = vmatpush1.bf16.msra.mxu0 %v3163_v25  ;;  %389 = vmatpush1.bf16.msra.mxu1 %v3187_v39  ;;  %v3271_v25 = vld [vmem:[#allocation7 + $0x1ac] ss:$16 sps:$4 sm:$0xff]   ;;  %v3286_v35 = vld [vmem:[#allocation7 + $0x204] ss:$16 sps:$4 sm:$0xff]   ;;  %v134_v39 = vld [vmem:[%s3957_s2] sm:$0xf] }
  0x7a   :  { %1230 = vmatprep.subr.bf16.mxu0 %v3190_v29  ;;  %1312 = vmatprep.subr.bf16.mxu1 %v3193_v40  ;;  %v3272_v29 = vld [vmem:[#allocation7 + $0x1c0] ss:$16 sps:$4 sm:$0xff]   ;;  %v3289_v36 = vld [vmem:[#allocation7 + $0x20c] ss:$16 sps:$4 sm:$0xff]   ;;  %v3879_v40 = vunpack.c.l.bf16 %v134_v39  ;;  %s3754_s12 = smov [#allocation11]  }
  0x7b   :  { %v3343_v39 = vld [vmem:[#allocation7 + $0x32c] ss:$16 sps:$4 sm:$0xff]   ;;  %s2730_s13 = sshll.u32 %s3754_s12, 4  ;;  %s2731_s13 = int_to_ptr.vmem [resolvable:$true] %s2730_s13 }
  0x7c   :  { %366 = vmatmul.mubr.bf16.vlgmr.msra.gmra.mrb[0].mxu0 %v101_v30  ;;  %407 = vmatmul.mubr.bf16.vlgmr.msra.gmra.mrb[0].mxu1 %v101_v30  ;;  %v3275_v30 = vld [vmem:[#allocation7 + $0x1c8] ss:$16 sps:$4 sm:$0xff]   ;;  %p3719_p13 = scmp.lt.s32.totalorder %s2731_s13, %s2731_s13 }
  0x7d   :  { %1231 = vmatpush1.bf16.msra.mxu0 %v3188_v33  ;;  %1313 = vmatpush1.bf16.msra.mxu1 %v3191_v43  ;;  %v3278_v33 = vld [vmem:[#allocation7 + $0x1e0] ss:$16 sps:$4 sm:$0xff]  }
  0x7e   :  { %1232 = vmatprep.subr.bf16.mxu0 %v3196_v34  ;;  %1314 = vmatprep.subr.bf16.mxu1 %v3199_v44  ;;  %v3281_v34 = vld [vmem:[#allocation7 + $0x1e8] ss:$16 sps:$4 sm:$0xff]  }
  0x81   :  { %1233 = vmatpush1.bf16.msra.mxu0 %v3194_v37  ;;  %1315 = vmatpush1.bf16.msra.mxu1 %v3197_v47  ;;  %v137_v37 = vlaneseq }
  0x82   :  { %1234 = vmatprep.subr.bf16.mxu0 %v3202_v38  ;;  %1316 = vmatprep.subr.bf16.mxu1 %v3205_v48 }
  0x83   :  { %v3874_v38 = vshrl.u32 %v137_v37, 7  ;;  %v3340_v37 = vld [vmem:[#allocation7 + $0x324] ss:$16 sps:$4 sm:$0xff]  }
  0x85   :  { %1235 = vmatpush1.bf16.msra.mxu0 %v3200_v41  ;;  %1317 = vmatpush1.bf16.msra.mxu1 %v3203_v51  ;;  %v3882_v41 = vsub.s32 0, %v3874_v38 }
  0x86   :  { %1236 = vmatprep.subr.bf16.mxu0 %v3208_v42  ;;  %1318 = vmatprep.subr.bf16.mxu1 %v3211_v52  ;;  %v3885_v42 = vsub.s32 2, %v3874_v38 }
  0x87   :  { %v140_v43 = vrot.slane %v3879_v40, %v3882_v41 }
  0x88   :  { %v144_v44 = vrot.slane %v3879_v40, %v3885_v42 }
  0x89   :  { %1237 = vmatpush1.bf16.msra.mxu0 %v3206_v45  ;;  %1319 = vmatpush1.bf16.msra.mxu1 %v3209_v55  ;;  %v160_v45 = vrot.slane %v140_v43, %v3882_v41  ;;  %v3338_v43 = vld [vmem:[#allocation7 + $0x320] ss:$16 sps:$4 sm:$0xff]  }
  0x8a   :  { %1238 = vmatprep.subr.bf16.mxu0 %v3214_v46  ;;  %1320 = vmatprep.subr.bf16.mxu1 %v3217_v56  ;;  %v164_v46 = vrot.slane %v144_v44, %v3882_v41  ;;  %v3341_v44 = vld [vmem:[#allocation7 + $0x328] ss:$16 sps:$4 sm:$0xff]  }
  0x8d   :  { %1239 = vmatpush1.bf16.msra.mxu0 %v3212_v49  ;;  %1321 = vmatpush1.bf16.msra.mxu1 %v3215_v59  ;;  %v3287_v59 = vld [vmem:[#allocation7 + $0x208] ss:$16 sps:$4 sm:$0xff]  }
  0x8e   :  { %1240 = vmatprep.subr.bf16.mxu0 %v3220_v50  ;;  %1322 = vmatprep.subr.bf16.mxu1 %v3223_v60  ;;  %v3894_v50 = vsub.s32 6, %v3874_v38 }
  0x90   :  { %v152_v56 = vrot.slane %v3879_v40, %v3894_v50 }
  0x91   :  { %1241 = vmatpush1.bf16.msra.mxu0 %v3218_v53  ;;  %1323 = vmatpush1.bf16.msra.mxu1 %v3221_v63 }
  0x92   :  { %1242 = vmatprep.subr.bf16.mxu0 %v3226_v54  ;;  %1324 = vmatprep.subr.bf16.mxu1 %v3229_v0  ;;  %v172_v63 = vrot.slane %v152_v56, %v3882_v41  ;;  %v3290_v0 = vld [vmem:[#allocation7 + $0x220] ss:$16 sps:$4 sm:$0xff]   ;;  %v3902_v56 = vsub.s32 4, %v3874_v38  ;;  %v3370_v38 = vld [vmem:[#allocation7 + $0x3c4] ss:$16 sps:$4 sm:$0xff]  }
  0x95   :  { %1243 = vmatpush1.bf16.msra.mxu0 %v3224_v57  ;;  %1325 = vmatpush1.bf16.msra.mxu1 %v3227_v3  ;;  %v3301_v3 = vld [vmem:[#allocation7 + $0x24c] ss:$16 sps:$4 sm:$0xff]  }
  0x96   :  { %1244 = vmatprep.subr.bf16.mxu0 %v3232_v58  ;;  %1326 = vmatprep.subr.bf16.mxu1 %v3235_v4  ;;  %v3284_v58 = vld [vmem:[#allocation7 + $0x200] ss:$16 sps:$4 sm:$0xff]  }
  0x99   :  { %1245 = vmatpush1.bf16.msra.mxu0 %v3230_v61  ;;  %1327 = vmatpush1.bf16.msra.mxu1 %v3233_v7  ;;  %v3292_v61 = vld [vmem:[#allocation7 + $0x224] ss:$16 sps:$4 sm:$0xff]  }
  0x9a   :  { %1246 = vmatprep.subr.bf16.mxu0 %v3238_v62  ;;  %1328 = vmatprep.subr.bf16.mxu1 %v3241_v8  ;;  %v3295_v62 = vld [vmem:[#allocation7 + $0x22c] ss:$16 sps:$4 sm:$0xff]   ;;  %v3296_v8 = vld [vmem:[#allocation7 + $0x240] ss:$16 sps:$4 sm:$0xff]  }
  0x9d   :  { %1247 = vmatpush1.bf16.msra.mxu0 %v3236_v1  ;;  %1329 = vmatpush1.bf16.msra.mxu1 %v3239_v11  ;;  %v3293_v1 = vld [vmem:[#allocation7 + $0x228] ss:$16 sps:$4 sm:$0xff]   ;;  %v3304_v11 = vld [vmem:[#allocation7 + $0x264] ss:$16 sps:$4 sm:$0xff]  }
  0x9e   :  { %1248 = vmatprep.subr.bf16.mxu0 %v3244_v2  ;;  %1330 = vmatprep.subr.bf16.mxu1 %v3247_v12  ;;  %v3298_v2 = vld [vmem:[#allocation7 + $0x244] ss:$16 sps:$4 sm:$0xff]   ;;  %v3307_v12 = vld [vmem:[#allocation7 + $0x26c] ss:$16 sps:$4 sm:$0xff]  }
  0xa1   :  { %1249 = vmatpush1.bf16.msra.mxu0 %v3242_v5  ;;  %1331 = vmatpush1.bf16.msra.mxu1 %v3245_v15  ;;  %v3302_v15 = vld [vmem:[#allocation7 + $0x260] ss:$16 sps:$4 sm:$0xff]  }
  0xa2   :  { %1250 = vmatprep.subr.bf16.mxu0 %v3250_v6  ;;  %1332 = vmatprep.subr.bf16.mxu1 %v3253_v16  ;;  %v3305_v16 = vld [vmem:[#allocation7 + $0x268] ss:$16 sps:$4 sm:$0xff]  }
  0xa5   :  { %1251 = vmatpush1.bf16.msra.mxu0 %v3248_v9  ;;  %1333 = vmatpush1.bf16.msra.mxu1 %v3251_v19  ;;  %v3299_v9 = vld [vmem:[#allocation7 + $0x248] ss:$16 sps:$4 sm:$0xff]   ;;  %v3308_v19 = vld [vmem:[#allocation7 + $0x280] ss:$16 sps:$4 sm:$0xff]  }
  0xa6   :  { %1252 = vmatprep.subr.bf16.mxu0 %v3256_v10  ;;  %1334 = vmatprep.subr.bf16.mxu1 %v3259_v20  ;;  %v3311_v20 = vld [vmem:[#allocation7 + $0x288] ss:$16 sps:$4 sm:$0xff]  }
  0xa9   :  { %1253 = vmatpush1.bf16.msra.mxu0 %v3254_v13  ;;  %1335 = vmatpush1.bf16.msra.mxu1 %v3257_v22  ;;  %v3319_v22 = vld [vmem:[#allocation7 + $0x2ac] ss:$16 sps:$4 sm:$0xff]  }
  0xaa   :  { %1254 = vmatprep.subr.bf16.mxu0 %v3262_v14  ;;  %1336 = vmatprep.subr.bf16.mxu1 %v3265_v23  ;;  %v3314_v23 = vld [vmem:[#allocation7 + $0x2a0] ss:$16 sps:$4 sm:$0xff]  }
  0xad   :  { %1255 = vmatpush1.bf16.msra.mxu0 %v3260_v17  ;;  %1337 = vmatpush1.bf16.msra.mxu1 %v3263_v24  ;;  %v3310_v17 = vld [vmem:[#allocation7 + $0x284] ss:$16 sps:$4 sm:$0xff]   ;;  %v3317_v24 = vld [vmem:[#allocation7 + $0x2a8] ss:$16 sps:$4 sm:$0xff]  }
  0xae   :  { %1256 = vmatprep.subr.bf16.mxu0 %v3268_v18  ;;  %1338 = vmatprep.subr.bf16.mxu1 %v3271_v25  ;;  %v3313_v18 = vld [vmem:[#allocation7 + $0x28c] ss:$16 sps:$4 sm:$0xff]   ;;  %v3322_v25 = vld [vmem:[#allocation7 + $0x2c4] ss:$16 sps:$4 sm:$0xff]  }
  0xb1   :  { %1257 = vmatpush1.bf16.msra.mxu0 %v3266_v21  ;;  %1339 = vmatpush1.bf16.msra.mxu1 %v3269_v26  ;;  %v3316_v21 = vld [vmem:[#allocation7 + $0x2a4] ss:$16 sps:$4 sm:$0xff]   ;;  %v3325_v26 = vld [vmem:[#allocation7 + $0x2cc] ss:$16 sps:$4 sm:$0xff]  }
  0xb2   :  { %1258 = vmatprep.subr.bf16.mxu0 %v3274_v27  ;;  %1340 = vmatprep.subr.bf16.mxu1 %v3277_v28  ;;  %v3320_v27 = vld [vmem:[#allocation7 + $0x2c0] ss:$16 sps:$4 sm:$0xff]   ;;  %v3323_v28 = vld [vmem:[#allocation7 + $0x2c8] ss:$16 sps:$4 sm:$0xff]  }
  0xb5   :  { %1259 = vmatpush1.bf16.msra.mxu0 %v3272_v29  ;;  %1341 = vmatpush1.bf16.msra.mxu1 %v3275_v30  ;;  %v3328_v29 = vld [vmem:[#allocation7 + $0x2e4] ss:$16 sps:$4 sm:$0xff]   ;;  %v3331_v30 = vld [vmem:[#allocation7 + $0x2ec] ss:$16 sps:$4 sm:$0xff]  }
  0xb6   :  { %1260 = vmatprep.subr.bf16.mxu0 %v3280_v31  ;;  %1342 = vmatprep.subr.bf16.mxu1 %v3283_v32  ;;  %v3326_v31 = vld [vmem:[#allocation7 + $0x2e0] ss:$16 sps:$4 sm:$0xff]   ;;  %v3329_v32 = vld [vmem:[#allocation7 + $0x2e8] ss:$16 sps:$4 sm:$0xff]  }
  0xb9   :  { %1261 = vmatpush1.bf16.msra.mxu0 %v3278_v33  ;;  %1343 = vmatpush1.bf16.msra.mxu1 %v3281_v34  ;;  %v3334_v33 = vld [vmem:[#allocation7 + $0x304] ss:$16 sps:$4 sm:$0xff]   ;;  %v3337_v34 = vld [vmem:[#allocation7 + $0x30c] ss:$16 sps:$4 sm:$0xff]  }
  0xba   :  { %1271 = vmatprep.subr.bf16.mxu0 %v3286_v35  ;;  %1353 = vmatprep.subr.bf16.mxu1 %v3289_v36  ;;  %v3332_v35 = vld [vmem:[#allocation7 + $0x300] ss:$16 sps:$4 sm:$0xff]   ;;  %v3335_v36 = vld [vmem:[#allocation7 + $0x308] ss:$16 sps:$4 sm:$0xff]  }
 0x14f   :  { %v367_v47 = vpop.f32.mrb[0].mxu0  ;;  %v3899_v4 = vpop.f32.mrb[0].mxu1 }
 0x150   :  { %v368_v48 = vadd.f32 %v367_v47, %v160_v45  ;;  %v369_v49 = vpop.f32.mrb[1].mxu0  ;;  %v410_v5 = vpop.f32.mrb[1].mxu1  ;;  %v3346_v45 = vld [vmem:[#allocation7 + $0x344] ss:$16 sps:$4 sm:$0xff]   ;;  %v3344_v47 = vld [vmem:[#allocation7 + $0x340] ss:$16 sps:$4 sm:$0xff]  }
 0x151   :  { %v370_v51 = vadd.f32 %v369_v49, %v164_v46  ;;  %v371_v52 = vpop.f32.mrb[2].mxu0  ;;  %v411_v6 = vadd.f32 %v410_v5, %v172_v63  ;;  %v412_v7 = vpop.f32.mrb[2].mxu1  ;;  %v3349_v46 = vld [vmem:[#allocation7 + $0x34c] ss:$16 sps:$4 sm:$0xff]   ;;  %v3352_v49 = vld [vmem:[#allocation7 + $0x364] ss:$16 sps:$4 sm:$0xff]  }
 0x152   :  { %v415_v53 = vmax.f32 %v368_v48, 0.0  ;;  %v372_v54 = vpop.f32.mrb[3].mxu0  ;;  %v413_v10 = vpop.f32.mrb[3].mxu1  ;;  %v3347_v48 = vld [vmem:[#allocation7 + $0x348] ss:$16 sps:$4 sm:$0xff]  }
 0x153   :  { %v416_v55 = vmax.f32 %v370_v51, 0.0  ;;  %v418_v13 = vmax.f32 %v411_v6, 0.0  ;;  %v3355_v51 = vld [vmem:[#allocation7 + $0x36c] ss:$16 sps:$4 sm:$0xff]   ;;  %v3350_v52 = vld [vmem:[#allocation7 + $0x360] ss:$16 sps:$4 sm:$0xff]  }
 0x154   :  { %v419_v60 = vpack.c.bf16 %v415_v53, %v415_v53  ;;  %v3353_v53 = vld [vmem:[#allocation7 + $0x368] ss:$16 sps:$4 sm:$0xff]   ;;  %v3358_v54 = vld [vmem:[#allocation7 + $0x384] ss:$16 sps:$4 sm:$0xff]   ;;  %v3379_v6 = vld [vmem:[#allocation7 + $0x3ec] ss:$16 sps:$4 sm:$0xff]  }
 0x155   :  { %v420_v57 = vpack.c.bf16 %v416_v55, %v416_v55  ;;  %v422_v14 = vpack.c.bf16 %v418_v13, %v418_v13  ;;  %v3361_v55 = vld [vmem:[#allocation7 + $0x38c] ss:$16 sps:$4 sm:$0xff]   ;;  %v3365_v63 = vld [vmem:[#allocation7 + $0x3a8] ss:$16 sps:$4 sm:$0xff]   ;;  %v3374_v7 = vld [vmem:[#allocation7 + $0x3e0] ss:$16 sps:$4 sm:$0xff]  }
 0x156   :  { %v3382_v10 = vld [vmem:[#allocation8 + $0x4] ss:$16 sps:$4 sm:$0xff]   ;;  %v3383_v13 = vld [vmem:[#allocation8 + $0x8] ss:$16 sps:$4 sm:$0xff]  }
 0x157   :  { %1262 = vmatprep.mubr.bf16.mxu0 %v420_v57  ;;  %1344 = vmatprep.mubr.bf16.mxu1 %v420_v57  ;;  %v3356_v57 = vld [vmem:[#allocation7 + $0x380] ss:$16 sps:$4 sm:$0xff]  }
 0x158   :  { %1263 = vmatmul.mubr.bf16.vlgmr.msra.gmra.mrb[4].mxu0 %v419_v60  ;;  %1345 = vmatmul.mubr.bf16.vlgmr.msra.gmra.mrb[4].mxu1 %v419_v60  ;;  %v3364_v60 = vld [vmem:[#allocation7 + $0x3a4] ss:$16 sps:$4 sm:$0xff]  }
 0x159   :  { %1272 = vmatpush1.bf16.msra.mxu0 %v3284_v58  ;;  %1354 = vmatpush1.bf16.msra.mxu1 %v3287_v59  ;;  %v3359_v58 = vld [vmem:[#allocation7 + $0x388] ss:$16 sps:$4 sm:$0xff]   ;;  %v148_v59 = vrot.slane %v3879_v40, %v3902_v56  ;;  %v3376_v40 = vld [vmem:[#allocation7 + $0x3e4] ss:$16 sps:$4 sm:$0xff]  }
 0x15a   :  { %1273 = vmatprep.subr.bf16.mxu0 %v3292_v61  ;;  %1355 = vmatprep.subr.bf16.mxu1 %v3295_v62  ;;  %v3367_v61 = vld [vmem:[#allocation7 + $0x3ac] ss:$16 sps:$4 sm:$0xff]   ;;  %v3362_v62 = vld [vmem:[#allocation7 + $0x3a0] ss:$16 sps:$4 sm:$0xff]  }
 0x15b   :  { %1303 = vmatprep.mubr.bf16.mxu0 %v422_v14  ;;  %1385 = vmatprep.mubr.bf16.mxu1 %v422_v14 }
 0x15d   :  { %1274 = vmatpush1.bf16.msra.mxu0 %v3290_v0  ;;  %1356 = vmatpush1.bf16.msra.mxu1 %v3293_v1  ;;  %v168_v0 = vrot.slane %v148_v59, %v3882_v41  ;;  %v3373_v1 = vld [vmem:[#allocation7 + $0x3cc] ss:$16 sps:$4 sm:$0xff]   ;;  %v3443_v59 = vld [vmem:[#allocation8 + $0x148] ss:$16 sps:$4 sm:$0xff]  }
 0x15e   :  { %1275 = vmatprep.subr.bf16.mxu0 %v3298_v2  ;;  %1357 = vmatprep.subr.bf16.mxu1 %v3301_v3  ;;  %v3368_v2 = vld [vmem:[#allocation7 + $0x3c0] ss:$16 sps:$4 sm:$0xff]   ;;  %v3371_v3 = vld [vmem:[#allocation7 + $0x3c8] ss:$16 sps:$4 sm:$0xff]  }
 0x15f   :  { %v409_v5 = vadd.f32 %v3899_v4, %v168_v0  ;;  %v3388_v4 = vld [vmem:[#allocation8 + $0x24] ss:$16 sps:$4 sm:$0xff]  }
 0x160   :  { %v3454_v0 = vld [vmem:[#allocation8 + $0x184] ss:$16 sps:$4 sm:$0xff]  }
 0x161   :  { %1276 = vmatpush1.bf16.msra.mxu0 %v3296_v8  ;;  %1358 = vmatpush1.bf16.msra.mxu1 %v3299_v9  ;;  %v3377_v8 = vld [vmem:[#allocation7 + $0x3e8] ss:$16 sps:$4 sm:$0xff]   ;;  %v417_v9 = vmax.f32 %v409_v5, 0.0  ;;  %v3463_v5 = vld [vmem:[#allocation8 + $0x1ac] ss:$16 sps:$4 sm:$0xff]  }
 0x162   :  { %1277 = vmatprep.subr.bf16.mxu0 %v3304_v11  ;;  %1359 = vmatprep.subr.bf16.mxu1 %v3307_v12  ;;  %v3385_v11 = vld [vmem:[#allocation8 + $0xc] ss:$16 sps:$4 sm:$0xff]   ;;  %v3380_v12 = vld [vmem:[#allocation8] ss:$16 sps:$4 sm:$0xff]  }
 0x163   :  { %v421_v14 = vpack.c.bf16 %v417_v9, %v417_v9  ;;  %v3464_v9 = vld [vmem:[#allocation8 + $0x1c0] ss:$16 sps:$4 sm:$0xff]  }
 0x165   :  { %1278 = vmatpush1.bf16.msra.mxu0 %v3302_v15  ;;  %1360 = vmatpush1.bf16.msra.mxu1 %v3305_v16  ;;  %v3391_v15 = vld [vmem:[#allocation8 + $0x2c] ss:$16 sps:$4 sm:$0xff]   ;;  %v3386_v16 = vld [vmem:[#allocation8 + $0x20] ss:$16 sps:$4 sm:$0xff]  }
 0x166   :  { %1279 = vmatprep.subr.bf16.mxu0 %v3310_v17  ;;  %1361 = vmatprep.subr.bf16.mxu1 %v3313_v18  ;;  %v3389_v17 = vld [vmem:[#allocation8 + $0x28] ss:$16 sps:$4 sm:$0xff]   ;;  %v3394_v18 = vld [vmem:[#allocation8 + $0x44] ss:$16 sps:$4 sm:$0xff]  }
 0x169   :  { %1280 = vmatpush1.bf16.msra.mxu0 %v3308_v19  ;;  %1362 = vmatpush1.bf16.msra.mxu1 %v3311_v20  ;;  %v3397_v19 = vld [vmem:[#allocation8 + $0x4c] ss:$16 sps:$4 sm:$0xff]   ;;  %v3392_v20 = vld [vmem:[#allocation8 + $0x40] ss:$16 sps:$4 sm:$0xff]  }
 0x16a   :  { %1281 = vmatprep.subr.bf16.mxu0 %v3316_v21  ;;  %1363 = vmatprep.subr.bf16.mxu1 %v3319_v22  ;;  %v3395_v21 = vld [vmem:[#allocation8 + $0x48] ss:$16 sps:$4 sm:$0xff]   ;;  %v3400_v22 = vld [vmem:[#allocation8 + $0x64] ss:$16 sps:$4 sm:$0xff]  }
 0x16d   :  { %1282 = vmatpush1.bf16.msra.mxu0 %v3314_v23  ;;  %1364 = vmatpush1.bf16.msra.mxu1 %v3317_v24  ;;  %v3403_v23 = vld [vmem:[#allocation8 + $0x6c] ss:$16 sps:$4 sm:$0xff]   ;;  %v3398_v24 = vld [vmem:[#allocation8 + $0x60] ss:$16 sps:$4 sm:$0xff]  }
 0x16e   :  { %1283 = vmatprep.subr.bf16.mxu0 %v3322_v25  ;;  %1365 = vmatprep.subr.bf16.mxu1 %v3325_v26  ;;  %v3401_v25 = vld [vmem:[#allocation8 + $0x68] ss:$16 sps:$4 sm:$0xff]   ;;  %v3406_v26 = vld [vmem:[#allocation8 + $0x84] ss:$16 sps:$4 sm:$0xff]  }
 0x171   :  { %1284 = vmatpush1.bf16.msra.mxu0 %v3320_v27  ;;  %1366 = vmatpush1.bf16.msra.mxu1 %v3323_v28  ;;  %v3409_v27 = vld [vmem:[#allocation8 + $0x8c] ss:$16 sps:$4 sm:$0xff]   ;;  %v3404_v28 = vld [vmem:[#allocation8 + $0x80] ss:$16 sps:$4 sm:$0xff]  }
 0x172   :  { %1285 = vmatprep.subr.bf16.mxu0 %v3328_v29  ;;  %1367 = vmatprep.subr.bf16.mxu1 %v3331_v30  ;;  %v3407_v29 = vld [vmem:[#allocation8 + $0x88] ss:$16 sps:$4 sm:$0xff]   ;;  %v3412_v30 = vld [vmem:[#allocation8 + $0xa4] ss:$16 sps:$4 sm:$0xff]  }
 0x175   :  { %1286 = vmatpush1.bf16.msra.mxu0 %v3326_v31  ;;  %1368 = vmatpush1.bf16.msra.mxu1 %v3329_v32  ;;  %v3415_v31 = vld [vmem:[#allocation8 + $0xac] ss:$16 sps:$4 sm:$0xff]   ;;  %v3410_v32 = vld [vmem:[#allocation8 + $0xa0] ss:$16 sps:$4 sm:$0xff]  }
 0x176   :  { %1287 = vmatprep.subr.bf16.mxu0 %v3334_v33  ;;  %1369 = vmatprep.subr.bf16.mxu1 %v3337_v34  ;;  %v3413_v33 = vld [vmem:[#allocation8 + $0xa8] ss:$16 sps:$4 sm:$0xff]   ;;  %v3418_v34 = vld [vmem:[#allocation8 + $0xc4] ss:$16 sps:$4 sm:$0xff]  }
 0x179   :  { %1288 = vmatpush1.bf16.msra.mxu0 %v3332_v35  ;;  %1370 = vmatpush1.bf16.msra.mxu1 %v3335_v36  ;;  %v3421_v35 = vld [vmem:[#allocation8 + $0xcc] ss:$16 sps:$4 sm:$0xff]   ;;  %v3416_v36 = vld [vmem:[#allocation8 + $0xc0] ss:$16 sps:$4 sm:$0xff]  }
 0x17a   :  { %1289 = vmatprep.subr.bf16.mxu0 %v3340_v37  ;;  %1371 = vmatprep.subr.bf16.mxu1 %v3343_v39  ;;  %v3419_v37 = vld [vmem:[#allocation8 + $0xc8] ss:$16 sps:$4 sm:$0xff]   ;;  %v3424_v39 = vld [vmem:[#allocation8 + $0xe4] ss:$16 sps:$4 sm:$0xff]  }
 0x17d   :  { %1290 = vmatpush1.bf16.msra.mxu0 %v3338_v43  ;;  %1372 = vmatpush1.bf16.msra.mxu1 %v3341_v44  ;;  %v3427_v43 = vld [vmem:[#allocation8 + $0xec] ss:$16 sps:$4 sm:$0xff]   ;;  %v3422_v44 = vld [vmem:[#allocation8 + $0xe0] ss:$16 sps:$4 sm:$0xff]  }
 0x17e   :  { %1291 = vmatprep.subr.bf16.mxu0 %v3346_v45  ;;  %1373 = vmatprep.subr.bf16.mxu1 %v3349_v46  ;;  %v3425_v45 = vld [vmem:[#allocation8 + $0xe8] ss:$16 sps:$4 sm:$0xff]   ;;  %v3430_v46 = vld [vmem:[#allocation8 + $0x104] ss:$16 sps:$4 sm:$0xff]  }
 0x181   :  { %1292 = vmatpush1.bf16.msra.mxu0 %v3344_v47  ;;  %1374 = vmatpush1.bf16.msra.mxu1 %v3347_v48  ;;  %v3433_v47 = vld [vmem:[#allocation8 + $0x10c] ss:$16 sps:$4 sm:$0xff]   ;;  %v3428_v48 = vld [vmem:[#allocation8 + $0x100] ss:$16 sps:$4 sm:$0xff]  }
 0x182   :  { %1293 = vmatprep.subr.bf16.mxu0 %v3352_v49  ;;  %1375 = vmatprep.subr.bf16.mxu1 %v3355_v51  ;;  %v3431_v49 = vld [vmem:[#allocation8 + $0x108] ss:$16 sps:$4 sm:$0xff]   ;;  %v3436_v51 = vld [vmem:[#allocation8 + $0x124] ss:$16 sps:$4 sm:$0xff]  }
 0x185   :  { %1294 = vmatpush1.bf16.msra.mxu0 %v3350_v52  ;;  %1376 = vmatpush1.bf16.msra.mxu1 %v3353_v53  ;;  %v3439_v52 = vld [vmem:[#allocation8 + $0x12c] ss:$16 sps:$4 sm:$0xff]   ;;  %v3434_v53 = vld [vmem:[#allocation8 + $0x120] ss:$16 sps:$4 sm:$0xff]  }
 0x186   :  { %1295 = vmatprep.subr.bf16.mxu0 %v3358_v54  ;;  %1377 = vmatprep.subr.bf16.mxu1 %v3361_v55  ;;  %v3437_v54 = vld [vmem:[#allocation8 + $0x128] ss:$16 sps:$4 sm:$0xff]   ;;  %v3442_v55 = vld [vmem:[#allocation8 + $0x144] ss:$16 sps:$4 sm:$0xff]  }
 0x189   :  { %1296 = vmatpush1.bf16.msra.mxu0 %v3356_v57  ;;  %1378 = vmatpush1.bf16.msra.mxu1 %v3359_v58  ;;  %v3445_v57 = vld [vmem:[#allocation8 + $0x14c] ss:$16 sps:$4 sm:$0xff]   ;;  %v3440_v58 = vld [vmem:[#allocation8 + $0x140] ss:$16 sps:$4 sm:$0xff]  }
 0x18a   :  { %1297 = vmatprep.subr.bf16.mxu0 %v3364_v60  ;;  %1379 = vmatprep.subr.bf16.mxu1 %v3367_v61  ;;  %v3448_v60 = vld [vmem:[#allocation8 + $0x164] ss:$16 sps:$4 sm:$0xff]   ;;  %v3451_v61 = vld [vmem:[#allocation8 + $0x16c] ss:$16 sps:$4 sm:$0xff]  }
 0x18d   :  { %1298 = vmatpush1.bf16.msra.mxu0 %v3362_v62  ;;  %1380 = vmatpush1.bf16.msra.mxu1 %v3365_v63  ;;  %v3446_v62 = vld [vmem:[#allocation8 + $0x160] ss:$16 sps:$4 sm:$0xff]   ;;  %v3449_v63 = vld [vmem:[#allocation8 + $0x168] ss:$16 sps:$4 sm:$0xff]  }
 0x18e   :  { %1299 = vmatprep.subr.bf16.mxu0 %v3370_v38  ;;  %1381 = vmatprep.subr.bf16.mxu1 %v3373_v1  ;;  %v3457_v38 = vld [vmem:[#allocation8 + $0x18c] ss:$16 sps:$4 sm:$0xff]   ;;  %v3452_v1 = vld [vmem:[#allocation8 + $0x180] ss:$16 sps:$4 sm:$0xff]  }
 0x191   :  { %1300 = vmatpush1.bf16.msra.mxu0 %v3368_v2  ;;  %1382 = vmatpush1.bf16.msra.mxu1 %v3371_v3  ;;  %v3455_v2 = vld [vmem:[#allocation8 + $0x188] ss:$16 sps:$4 sm:$0xff]   ;;  %v3460_v3 = vld [vmem:[#allocation8 + $0x1a4] ss:$16 sps:$4 sm:$0xff]  }
 0x192   :  { %1301 = vmatprep.subr.bf16.mxu0 %v3376_v40  ;;  %1383 = vmatprep.subr.bf16.mxu1 %v3379_v6  ;;  %v3458_v40 = vld [vmem:[#allocation8 + $0x1a0] ss:$16 sps:$4 sm:$0xff]   ;;  %v3461_v6 = vld [vmem:[#allocation8 + $0x1a8] ss:$16 sps:$4 sm:$0xff]  }
 0x195   :  { %1302 = vmatpush1.bf16.msra.mxu0 %v3374_v7  ;;  %1384 = vmatpush1.bf16.msra.mxu1 %v3377_v8  ;;  %v3466_v7 = vld [vmem:[#allocation8 + $0x1c4] ss:$16 sps:$4 sm:$0xff]   ;;  %v3469_v8 = vld [vmem:[#allocation8 + $0x1cc] ss:$16 sps:$4 sm:$0xff]  }
 0x196   :  { %2209 = vmatprep.subr.bf16.mxu0 %v3382_v10  ;;  %2291 = vmatprep.subr.bf16.mxu1 %v3385_v11  ;;  %v3467_v10 = vld [vmem:[#allocation8 + $0x1c8] ss:$16 sps:$4 sm:$0xff]   ;;  %v3472_v11 = vld [vmem:[#allocation8 + $0x1e4] ss:$16 sps:$4 sm:$0xff]  }
 0x198   :  { %1304 = vmatmul.mubr.bf16.vlgmr.msra.gmra.mrb[4].mxu0 %v421_v14  ;;  %1386 = vmatmul.mubr.bf16.vlgmr.msra.gmra.mrb[4].mxu1 %v421_v14  ;;  %v3473_v14 = vld [vmem:[#allocation8 + $0x1e8] ss:$16 sps:$4 sm:$0xff]  }
 0x199   :  { %2210 = vmatpush1.bf16.msra.mxu0 %v3380_v12  ;;  %2292 = vmatpush1.bf16.msra.mxu1 %v3383_v13  ;;  %v3475_v12 = vld [vmem:[#allocation8 + $0x1ec] ss:$16 sps:$4 sm:$0xff]   ;;  %v3470_v13 = vld [vmem:[#allocation8 + $0x1e0] ss:$16 sps:$4 sm:$0xff]  }
 0x19a   :  { %2211 = vmatprep.subr.bf16.mxu0 %v3388_v4  ;;  %2293 = vmatprep.subr.bf16.mxu1 %v3391_v15  ;;  %v3478_v4 = vld [vmem:[#allocation8 + $0x204] ss:$16 sps:$4 sm:$0xff]   ;;  %v3481_v15 = vld [vmem:[#allocation8 + $0x20c] ss:$16 sps:$4 sm:$0xff]  }
 0x19d   :  { %2212 = vmatpush1.bf16.msra.mxu0 %v3386_v16  ;;  %2294 = vmatpush1.bf16.msra.mxu1 %v3389_v17  ;;  %v551_v16 = vld [vmem:[%s3959_s4] sm:$0xf] }
 0x19e   :  { %2213 = vmatprep.subr.bf16.mxu0 %v3394_v18  ;;  %2295 = vmatprep.subr.bf16.mxu1 %v3397_v19  ;;  %v3911_v17 = vunpack.c.l.bf16 %v551_v16  ;;  %v3535_v16 = vld [vmem:[#allocation8 + $0x32c] ss:$16 sps:$4 sm:$0xff]  }
 0x1a0   :  { %v557_v18 = vrot.slane %v3911_v17, %v3882_v41  ;;  %v561_v19 = vrot.slane %v3911_v17, %v3885_v42 }
 0x1a1   :  { %2214 = vmatpush1.bf16.msra.mxu0 %v3392_v20  ;;  %2296 = vmatpush1.bf16.msra.mxu1 %v3395_v21  ;;  %v569_v20 = vrot.slane %v3911_v17, %v3894_v50 }
 0x1a2   :  { %2215 = vmatprep.subr.bf16.mxu0 %v3400_v22  ;;  %2297 = vmatprep.subr.bf16.mxu1 %v3403_v23  ;;  %v577_v21 = vrot.slane %v557_v18, %v3882_v41  ;;  %v581_v22 = vrot.slane %v561_v19, %v3882_v41  ;;  %v3530_v18 = vld [vmem:[#allocation8 + $0x320] ss:$16 sps:$4 sm:$0xff]   ;;  %v3533_v19 = vld [vmem:[#allocation8 + $0x328] ss:$16 sps:$4 sm:$0xff]  }
 0x1a3   :  { %v589_v23 = vrot.slane %v569_v20, %v3882_v41  ;;  %v3538_v20 = vld [vmem:[#allocation8 + $0x344] ss:$16 sps:$4 sm:$0xff]  }
 0x1a5   :  { %2216 = vmatpush1.bf16.msra.mxu0 %v3398_v24  ;;  %2298 = vmatpush1.bf16.msra.mxu1 %v3401_v25 }
 0x1a6   :  { %2217 = vmatprep.subr.bf16.mxu0 %v3406_v26  ;;  %2299 = vmatprep.subr.bf16.mxu1 %v3409_v27 }
 0x1a9   :  { %2218 = vmatpush1.bf16.msra.mxu0 %v3404_v28  ;;  %2300 = vmatpush1.bf16.msra.mxu1 %v3407_v29 }
 0x1aa   :  { %2219 = vmatprep.subr.bf16.mxu0 %v3412_v30  ;;  %2301 = vmatprep.subr.bf16.mxu1 %v3415_v31 }
 0x1ad   :  { %2220 = vmatpush1.bf16.msra.mxu0 %v3410_v32  ;;  %2302 = vmatpush1.bf16.msra.mxu1 %v3413_v33 }
 0x1ae   :  { %2221 = vmatprep.subr.bf16.mxu0 %v3418_v34  ;;  %2303 = vmatprep.subr.bf16.mxu1 %v3421_v35 }
 0x1b1   :  { %2222 = vmatpush1.bf16.msra.mxu0 %v3416_v36  ;;  %2304 = vmatpush1.bf16.msra.mxu1 %v3419_v37 }
 0x1b2   :  { %2223 = vmatprep.subr.bf16.mxu0 %v3424_v39  ;;  %2305 = vmatprep.subr.bf16.mxu1 %v3427_v43  ;;  %v3476_v43 = vld [vmem:[#allocation8 + $0x200] ss:$16 sps:$4 sm:$0xff]  }
 0x1b5   :  { %2224 = vmatpush1.bf16.msra.mxu0 %v3422_v44  ;;  %2306 = vmatpush1.bf16.msra.mxu1 %v3425_v45  ;;  %v3479_v44 = vld [vmem:[#allocation8 + $0x208] ss:$16 sps:$4 sm:$0xff]  }
 0x1b6   :  { %2225 = vmatprep.subr.bf16.mxu0 %v3430_v46  ;;  %2307 = vmatprep.subr.bf16.mxu1 %v3433_v47  ;;  %v3484_v46 = vld [vmem:[#allocation8 + $0x224] ss:$16 sps:$4 sm:$0xff]   ;;  %v3487_v47 = vld [vmem:[#allocation8 + $0x22c] ss:$16 sps:$4 sm:$0xff]  }
 0x1b9   :  { %2226 = vmatpush1.bf16.msra.mxu0 %v3428_v48  ;;  %2308 = vmatpush1.bf16.msra.mxu1 %v3431_v49  ;;  %v3482_v49 = vld [vmem:[#allocation8 + $0x220] ss:$16 sps:$4 sm:$0xff]  }
 0x1ba   :  { %2227 = vmatprep.subr.bf16.mxu0 %v3436_v51  ;;  %2309 = vmatprep.subr.bf16.mxu1 %v3439_v52  ;;  %v3485_v51 = vld [vmem:[#allocation8 + $0x228] ss:$16 sps:$4 sm:$0xff]   ;;  %v3490_v52 = vld [vmem:[#allocation8 + $0x244] ss:$16 sps:$4 sm:$0xff]  }
 0x1bd   :  { %2228 = vmatpush1.bf16.msra.mxu0 %v3434_v53  ;;  %2310 = vmatpush1.bf16.msra.mxu1 %v3437_v54  ;;  %v3493_v53 = vld [vmem:[#allocation8 + $0x24c] ss:$16 sps:$4 sm:$0xff]   ;;  %v3488_v54 = vld [vmem:[#allocation8 + $0x240] ss:$16 sps:$4 sm:$0xff]  }
 0x1be   :  { %2229 = vmatprep.subr.bf16.mxu0 %v3442_v55  ;;  %2311 = vmatprep.subr.bf16.mxu1 %v3445_v57  ;;  %v3491_v55 = vld [vmem:[#allocation8 + $0x248] ss:$16 sps:$4 sm:$0xff]   ;;  %v3496_v57 = vld [vmem:[#allocation8 + $0x264] ss:$16 sps:$4 sm:$0xff]  }
 0x1c1   :  { %2230 = vmatpush1.bf16.msra.mxu0 %v3440_v58  ;;  %2312 = vmatpush1.bf16.msra.mxu1 %v3443_v59  ;;  %v3499_v58 = vld [vmem:[#allocation8 + $0x26c] ss:$16 sps:$4 sm:$0xff]   ;;  %v3494_v59 = vld [vmem:[#allocation8 + $0x260] ss:$16 sps:$4 sm:$0xff]  }
 0x1c2   :  { %2231 = vmatprep.subr.bf16.mxu0 %v3448_v60  ;;  %2313 = vmatprep.subr.bf16.mxu1 %v3451_v61  ;;  %v3497_v60 = vld [vmem:[#allocation8 + $0x268] ss:$16 sps:$4 sm:$0xff]   ;;  %v3502_v61 = vld [vmem:[#allocation8 + $0x284] ss:$16 sps:$4 sm:$0xff]  }
 0x1c5   :  { %2232 = vmatpush1.bf16.msra.mxu0 %v3446_v62  ;;  %2314 = vmatpush1.bf16.msra.mxu1 %v3449_v63  ;;  %v3505_v62 = vld [vmem:[#allocation8 + $0x28c] ss:$16 sps:$4 sm:$0xff]   ;;  %v3500_v63 = vld [vmem:[#allocation8 + $0x280] ss:$16 sps:$4 sm:$0xff]  }
 0x1c6   :  { %2233 = vmatprep.subr.bf16.mxu0 %v3454_v0  ;;  %2315 = vmatprep.subr.bf16.mxu1 %v3457_v38  ;;  %v3503_v0 = vld [vmem:[#allocation8 + $0x288] ss:$16 sps:$4 sm:$0xff]   ;;  %v3508_v38 = vld [vmem:[#allocation8 + $0x2a4] ss:$16 sps:$4 sm:$0xff]  }
 0x1c9   :  { %2234 = vmatpush1.bf16.msra.mxu0 %v3452_v1  ;;  %2316 = vmatpush1.bf16.msra.mxu1 %v3455_v2  ;;  %v3511_v1 = vld [vmem:[#allocation8 + $0x2ac] ss:$16 sps:$4 sm:$0xff]   ;;  %v3506_v2 = vld [vmem:[#allocation8 + $0x2a0] ss:$16 sps:$4 sm:$0xff]  }
 0x1ca   :  { %2235 = vmatprep.subr.bf16.mxu0 %v3460_v3  ;;  %2317 = vmatprep.subr.bf16.mxu1 %v3463_v5  ;;  %v3509_v3 = vld [vmem:[#allocation8 + $0x2a8] ss:$16 sps:$4 sm:$0xff]   ;;  %v3514_v5 = vld [vmem:[#allocation8 + $0x2c4] ss:$16 sps:$4 sm:$0xff]  }
 0x1cd   :  { %2236 = vmatpush1.bf16.msra.mxu0 %v3458_v40  ;;  %2318 = vmatpush1.bf16.msra.mxu1 %v3461_v6  ;;  %v3517_v40 = vld [vmem:[#allocation8 + $0x2cc] ss:$16 sps:$4 sm:$0xff]   ;;  %v3512_v6 = vld [vmem:[#allocation8 + $0x2c0] ss:$16 sps:$4 sm:$0xff]  }
 0x1ce   :  { %2237 = vmatprep.subr.bf16.mxu0 %v3466_v7  ;;  %2319 = vmatprep.subr.bf16.mxu1 %v3469_v8  ;;  %v3515_v7 = vld [vmem:[#allocation8 + $0x2c8] ss:$16 sps:$4 sm:$0xff]   ;;  %v3520_v8 = vld [vmem:[#allocation8 + $0x2e4] ss:$16 sps:$4 sm:$0xff]  }
 0x1d1   :  { %2238 = vmatpush1.bf16.msra.mxu0 %v3464_v9  ;;  %2320 = vmatpush1.bf16.msra.mxu1 %v3467_v10  ;;  %v3523_v9 = vld [vmem:[#allocation8 + $0x2ec] ss:$16 sps:$4 sm:$0xff]   ;;  %v3518_v10 = vld [vmem:[#allocation8 + $0x2e0] ss:$16 sps:$4 sm:$0xff]  }
 0x1d2   :  { %2239 = vmatprep.subr.bf16.mxu0 %v3472_v11  ;;  %2321 = vmatprep.subr.bf16.mxu1 %v3475_v12  ;;  %v3521_v11 = vld [vmem:[#allocation8 + $0x2e8] ss:$16 sps:$4 sm:$0xff]   ;;  %v3526_v12 = vld [vmem:[#allocation8 + $0x304] ss:$16 sps:$4 sm:$0xff]  }
 0x1d5   :  { %2240 = vmatpush1.bf16.msra.mxu0 %v3470_v13  ;;  %2322 = vmatpush1.bf16.msra.mxu1 %v3473_v14  ;;  %v3529_v13 = vld [vmem:[#allocation8 + $0x30c] ss:$16 sps:$4 sm:$0xff]   ;;  %v3524_v14 = vld [vmem:[#allocation8 + $0x300] ss:$16 sps:$4 sm:$0xff]  }
 0x1d6   :  { %2250 = vmatprep.subr.bf16.mxu0 %v3478_v4  ;;  %2332 = vmatprep.subr.bf16.mxu1 %v3481_v15  ;;  %v3527_v4 = vld [vmem:[#allocation8 + $0x308] ss:$16 sps:$4 sm:$0xff]   ;;  %v3532_v15 = vld [vmem:[#allocation8 + $0x324] ss:$16 sps:$4 sm:$0xff]  }
 0x26b   :  { %v1305_v24 = vpop.f32.mrb[4].mxu0  ;;  %v3922_v25 = vpop.f32.mrb[4].mxu1 }
 0x26c   :  { %v3105_v26 = vadd.f32 %v1305_v24, %v577_v21  ;;  %v1307_v27 = vpop.f32.mrb[5].mxu0  ;;  %v1389_v28 = vpop.f32.mrb[5].mxu1  ;;  %v3541_v21 = vld [vmem:[#allocation8 + $0x34c] ss:$16 sps:$4 sm:$0xff]   ;;  %v3544_v24 = vld [vmem:[#allocation8 + $0x364] ss:$16 sps:$4 sm:$0xff]  }
 0x26d   :  { %v3106_v29 = vadd.f32 %v1307_v27, %v581_v22  ;;  %v3108_v30 = vadd.f32 %v1389_v28, %v589_v23  ;;  %v1309_v31 = vpop.f32.mrb[6].mxu0  ;;  %v1391_v32 = vpop.f32.mrb[6].mxu1  ;;  %v3536_v22 = vld [vmem:[#allocation8 + $0x340] ss:$16 sps:$4 sm:$0xff]   ;;  %v3539_v23 = vld [vmem:[#allocation8 + $0x348] ss:$16 sps:$4 sm:$0xff]  }
 0x26e   :  { %v1394_v33 = vmax.f32 %v3105_v26, 0.0  ;;  %v1310_v34 = vpop.f32.mrb[7].mxu0  ;;  %v1392_v35 = vpop.f32.mrb[7].mxu1  ;;  %v3547_v26 = vld [vmem:[#allocation8 + $0x36c] ss:$16 sps:$4 sm:$0xff]  }
 0x26f   :  { %v1395_v36 = vmax.f32 %v3106_v29, 0.0  ;;  %v1397_v37 = vmax.f32 %v3108_v30, 0.0  ;;  %v3542_v27 = vld [vmem:[#allocation8 + $0x360] ss:$16 sps:$4 sm:$0xff]   ;;  %v3545_v28 = vld [vmem:[#allocation8 + $0x368] ss:$16 sps:$4 sm:$0xff]  }
 0x270   :  { %v1398_v45 = vpack.c.bf16 %v1394_v33, %v1394_v33  ;;  %v3550_v29 = vld [vmem:[#allocation8 + $0x384] ss:$16 sps:$4 sm:$0xff]   ;;  %v3553_v30 = vld [vmem:[#allocation8 + $0x38c] ss:$16 sps:$4 sm:$0xff]   ;;  %v3548_v31 = vld [vmem:[#allocation8 + $0x380] ss:$16 sps:$4 sm:$0xff]   ;;  %v565_v33 = vrot.slane %v3911_v17, %v3902_v56 }
 0x271   :  { %v1399_v39 = vpack.c.bf16 %v1395_v36, %v1395_v36  ;;  %v1401_v48 = vpack.c.bf16 %v1397_v37, %v1397_v37  ;;  %v3551_v32 = vld [vmem:[#allocation8 + $0x388] ss:$16 sps:$4 sm:$0xff]   ;;  %v3556_v34 = vld [vmem:[#allocation8 + $0x3a4] ss:$16 sps:$4 sm:$0xff]   ;;  %v3559_v35 = vld [vmem:[#allocation8 + $0x3ac] ss:$16 sps:$4 sm:$0xff]  }
 0x272   :  { %v3554_v36 = vld [vmem:[#allocation8 + $0x3a0] ss:$16 sps:$4 sm:$0xff]   ;;  %v3557_v37 = vld [vmem:[#allocation8 + $0x3a8] ss:$16 sps:$4 sm:$0xff]  }
 0x273   :  { %2241 = vmatprep.mubr.bf16.mxu0 %v1399_v39  ;;  %2323 = vmatprep.mubr.bf16.mxu1 %v1399_v39  ;;  %v585_v39 = vrot.slane %v565_v33, %v3882_v41 }
 0x274   :  { %2242 = vmatmul.mubr.bf16.vlgmr.msra.gmra.mrb[8].mxu0 %v1398_v45  ;;  %2324 = vmatmul.mubr.bf16.vlgmr.msra.gmra.mrb[8].mxu1 %v1398_v45  ;;  %v3560_v45 = vld [vmem:[#allocation8 + $0x3c0] ss:$16 sps:$4 sm:$0xff]  }
 0x275   :  { %2251 = vmatpush1.bf16.msra.mxu0 %v3476_v43  ;;  %2333 = vmatpush1.bf16.msra.mxu1 %v3479_v44  ;;  %v3562_v43 = vld [vmem:[#allocation8 + $0x3c4] ss:$16 sps:$4 sm:$0xff]   ;;  %v3565_v44 = vld [vmem:[#allocation8 + $0x3cc] ss:$16 sps:$4 sm:$0xff]   ;;  %v3107_v17 = vadd.f32 %v3922_v25, %v585_v39 }
 0x276   :  { %2282 = vmatprep.mubr.bf16.mxu0 %v1401_v48  ;;  %2364 = vmatprep.mubr.bf16.mxu1 %v1401_v48  ;;  %v3571_v48 = vld [vmem:[#allocation8 + $0x3ec] ss:$16 sps:$4 sm:$0xff]  }
 0x277   :  { %2252 = vmatprep.subr.bf16.mxu0 %v3484_v46  ;;  %2334 = vmatprep.subr.bf16.mxu1 %v3487_v47  ;;  %v3563_v46 = vld [vmem:[#allocation8 + $0x3c8] ss:$16 sps:$4 sm:$0xff]   ;;  %v3568_v47 = vld [vmem:[#allocation8 + $0x3e4] ss:$16 sps:$4 sm:$0xff]  }
 0x278   :  { %v3576_v25 = vld [vmem:[#allocation10 + $0x48] sm:$0xff]  }
 0x279   :  { %2253 = vmatpush1.bf16.msra.mxu0 %v3482_v49  ;;  %2335 = vmatpush1.bf16.msra.mxu1 %v3485_v51  ;;  %v3566_v49 = vld [vmem:[#allocation8 + $0x3e0] ss:$16 sps:$4 sm:$0xff]   ;;  %v3569_v51 = vld [vmem:[#allocation8 + $0x3e8] ss:$16 sps:$4 sm:$0xff]  }
 0x27a   :  { %2254 = vmatprep.subr.bf16.mxu0 %v3490_v52  ;;  %2336 = vmatprep.subr.bf16.mxu1 %v3493_v53  ;;  %v1396_v52 = vmax.f32 %v3107_v17, 0.0  ;;  %v3572_v53 = vld [vmem:[#allocation10 + $0x40] sm:$0xff]  }
 0x27d   :  { %2255 = vmatpush1.bf16.msra.mxu0 %v3488_v54  ;;  %2337 = vmatpush1.bf16.msra.mxu1 %v3491_v55  ;;  %v3573_v54 = vld [vmem:[#allocation10 + $0xc0] sm:$0xff]  }
 0x27e   :  { %2256 = vmatprep.subr.bf16.mxu0 %v3496_v57  ;;  %2338 = vmatprep.subr.bf16.mxu1 %v3499_v58  ;;  %v3574_v55 = vld [vmem:[#allocation10] sm:$0xff]   ;;  %v1400_v58 = vpack.c.bf16 %v1396_v52, %v1396_v52 }
 0x27f   :  { %v3575_v57 = vld [vmem:[#allocation10 + $0x80] sm:$0xff]  }
 0x281   :  { %2257 = vmatpush1.bf16.msra.mxu0 %v3494_v59  ;;  %2339 = vmatpush1.bf16.msra.mxu1 %v3497_v60  ;;  %v3577_v59 = vld [vmem:[#allocation10 + $0xc8] sm:$0xff]  }
 0x282   :  { %2258 = vmatprep.subr.bf16.mxu0 %v3502_v61  ;;  %2340 = vmatprep.subr.bf16.mxu1 %v3505_v62  ;;  %v3578_v60 = vld [vmem:[#allocation10 + $0x8] sm:$0xff]   ;;  %v3580_v62 = vld [vmem:[#allocation10 + $0x50] sm:$0xff]  }
 0x283   :  { %v3579_v61 = vld [vmem:[#allocation10 + $0x88] sm:$0xff]  }
 0x285   :  { %2259 = vmatpush1.bf16.msra.mxu0 %v3500_v63  ;;  %2341 = vmatpush1.bf16.msra.mxu1 %v3503_v0  ;;  %v3581_v63 = vld [vmem:[#allocation10 + $0xd0] sm:$0xff]  }
 0x286   :  { %2260 = vmatprep.subr.bf16.mxu0 %v3508_v38  ;;  %2342 = vmatprep.subr.bf16.mxu1 %v3511_v1  ;;  %v3582_v0 = vld [vmem:[#allocation10 + $0x10] sm:$0xff]   ;;  %v3584_v1 = vld [vmem:[#allocation10 + $0x58] sm:$0xff]  }
 0x287   :  { %v3583_v38 = vld [vmem:[#allocation10 + $0x90] sm:$0xff]  }
 0x289   :  { %2261 = vmatpush1.bf16.msra.mxu0 %v3506_v2  ;;  %2343 = vmatpush1.bf16.msra.mxu1 %v3509_v3  ;;  %v3585_v2 = vld [vmem:[#allocation10 + $0xd8] sm:$0xff]  }
 0x28a   :  { %2262 = vmatprep.subr.bf16.mxu0 %v3514_v5  ;;  %2344 = vmatprep.subr.bf16.mxu1 %v3517_v40  ;;  %v3586_v3 = vld [vmem:[#allocation10 + $0x18] sm:$0xff]   ;;  %v3588_v40 = vld [vmem:[#allocation10 + $0x60] sm:$0xff]  }
 0x28b   :  { %v3587_v5 = vld [vmem:[#allocation10 + $0x98] sm:$0xff]  }
 0x28d   :  { %2263 = vmatpush1.bf16.msra.mxu0 %v3512_v6  ;;  %2345 = vmatpush1.bf16.msra.mxu1 %v3515_v7  ;;  %v3589_v6 = vld [vmem:[#allocation10 + $0xe0] sm:$0xff]  }
 0x28e   :  { %2264 = vmatprep.subr.bf16.mxu0 %v3520_v8  ;;  %2346 = vmatprep.subr.bf16.mxu1 %v3523_v9  ;;  %v3590_v7 = vld [vmem:[#allocation10 + $0x20] sm:$0xff]   ;;  %v3592_v9 = vld [vmem:[#allocation10 + $0x68] sm:$0xff]  }
 0x28f   :  { %v3591_v8 = vld [vmem:[#allocation10 + $0xa0] sm:$0xff]  }
 0x291   :  { %2265 = vmatpush1.bf16.msra.mxu0 %v3518_v10  ;;  %2347 = vmatpush1.bf16.msra.mxu1 %v3521_v11  ;;  %v3593_v10 = vld [vmem:[#allocation10 + $0xe8] sm:$0xff]  }
 0x292   :  { %2266 = vmatprep.subr.bf16.mxu0 %v3526_v12  ;;  %2348 = vmatprep.subr.bf16.mxu1 %v3529_v13  ;;  %v3594_v11 = vld [vmem:[#allocation10 + $0x28] sm:$0xff]   ;;  %v3596_v13 = vld [vmem:[#allocation10 + $0x70] sm:$0xff]  }
 0x293   :  { %v3595_v12 = vld [vmem:[#allocation10 + $0xa8] sm:$0xff]  }
 0x295   :  { %2267 = vmatpush1.bf16.msra.mxu0 %v3524_v14  ;;  %2349 = vmatpush1.bf16.msra.mxu1 %v3527_v4  ;;  %v3597_v14 = vld [vmem:[#allocation10 + $0xf0] sm:$0xff]  }
 0x296   :  { %2268 = vmatprep.subr.bf16.mxu0 %v3532_v15  ;;  %2350 = vmatprep.subr.bf16.mxu1 %v3535_v16  ;;  %v3598_v4 = vld [vmem:[#allocation10 + $0x30] sm:$0xff]   ;;  %v3600_v16 = vld [vmem:[#allocation10 + $0x78] sm:$0xff]  }
 0x297   :  { %v3599_v15 = vld [vmem:[#allocation10 + $0xb0] sm:$0xff]  }
 0x299   :  { %2269 = vmatpush1.bf16.msra.mxu0 %v3530_v18  ;;  %2351 = vmatpush1.bf16.msra.mxu1 %v3533_v19  ;;  %v3601_v18 = vld [vmem:[#allocation10 + $0xf8] sm:$0xff]  }
 0x29a   :  { %2270 = vmatprep.subr.bf16.mxu0 %v3538_v20  ;;  %2352 = vmatprep.subr.bf16.mxu1 %v3541_v21  ;;  %v3602_v19 = vld [vmem:[#allocation10 + $0x38] sm:$0xff]  }
 0x29b   :  { %v3603_v20 = vld [vmem:[#allocation10 + $0xb8] sm:$0xff]  }
 0x29c   :  { %v1530_v21 = vld [vmem:[%s3961_s6] sm:$0xf] }
 0x29d   :  { %2271 = vmatpush1.bf16.msra.mxu0 %v3536_v22  ;;  %2353 = vmatpush1.bf16.msra.mxu1 %v3539_v23  ;;  %v1531_v22 = vunpack.c.l.bf16 %v1530_v21 }
 0x29e   :  { %2272 = vmatprep.subr.bf16.mxu0 %v3544_v24  ;;  %2354 = vmatprep.subr.bf16.mxu1 %v3547_v26 }
 0x29f   :  { %v1536_v23 = vrot.slane %v1531_v22, %v3882_v41  ;;  %v1544_v24 = vrot.slane %v1531_v22, %v3902_v56  ;;  %v1540_v26 = vrot.slane %v1531_v22, %v3885_v42 }
 0x2a1   :  { %2273 = vmatpush1.bf16.msra.mxu0 %v3542_v27  ;;  %2355 = vmatpush1.bf16.msra.mxu1 %v3545_v28  ;;  %v1548_v27 = vrot.slane %v1531_v22, %v3894_v50  ;;  %v1556_v28 = vrot.slane %v1536_v23, %v3882_v41 }
 0x2a2   :  { %2274 = vmatprep.subr.bf16.mxu0 %v3550_v29  ;;  %2356 = vmatprep.subr.bf16.mxu1 %v3553_v30  ;;  %v1564_v29 = vrot.slane %v1544_v24, %v3882_v41  ;;  %v1560_v30 = vrot.slane %v1540_v26, %v3882_v41 }
 0x2a5   :  { %2275 = vmatpush1.bf16.msra.mxu0 %v3548_v31  ;;  %2357 = vmatpush1.bf16.msra.mxu1 %v3551_v32  ;;  %v1568_v31 = vrot.slane %v1548_v27, %v3882_v41 }
 0x2a6   :  { %2276 = vmatprep.subr.bf16.mxu0 %v3556_v34  ;;  %2358 = vmatprep.subr.bf16.mxu1 %v3559_v35 }
 0x2a9   :  { %2277 = vmatpush1.bf16.msra.mxu0 %v3554_v36  ;;  %2359 = vmatpush1.bf16.msra.mxu1 %v3557_v37 }
 0x2aa   :  { %2278 = vmatprep.subr.bf16.mxu0 %v3562_v43  ;;  %2360 = vmatprep.subr.bf16.mxu1 %v3565_v44 }
 0x2ad   :  { %2279 = vmatpush1.bf16.msra.mxu0 %v3560_v45  ;;  %2361 = vmatpush1.bf16.msra.mxu1 %v3563_v46 }
 0x2ae   :  { %2280 = vmatprep.subr.bf16.mxu0 %v3568_v47  ;;  %2362 = vmatprep.subr.bf16.mxu1 %v3571_v48 }
 0x2b1   :  { %2281 = vmatpush1.bf16.msra.mxu0 %v3566_v49  ;;  %2363 = vmatpush1.bf16.msra.mxu1 %v3569_v51 }
 0x2b2   :  { %3061 = vmatprep.subr.bf16.mxu0 %v3572_v53  ;;  %3083 = vmatprep.subr.bf16.mxu1 %v3573_v54  ;;  %v2445_v53 = vld [vmem:[%s3963_s8] sm:$0x1]  ;;  %s3714_s8 = scalar_lea.vmem %s2731_s13, 128 }
 0x2b3   :  { %v2446_v54 = vunpack.c.l.bf16 %v2445_v53  ;;  %p3715_p12 = scmp.ne.s32.totalorder %s2731_s13, %s3714_s8  ;;  %p3720_p0 = scmp.lt.s32.totalorder %s3714_s8, %s3714_s8 }
 0x2b4   :  { %2283 = vmatmul.mubr.bf16.vlgmr.msra.gmra.mrb[8].mxu0 %v1400_v58  ;;  %2365 = vmatmul.mubr.bf16.vlgmr.msra.gmra.mrb[8].mxu1 %v1400_v58 }
 0x2b5   :  { %3062 = vmatpush3.bf16.msra.mxu0 %v3574_v55  ;;  %3084 = vmatpush3.bf16.msra.mxu1 %v3575_v57  ;;  %v2450_v58 = vrot.slane %v2446_v54, %v3882_v41  ;;  %p3721_p1 = por %p3720_p0, %p3719_p13 }
 0x2b6   :  { %3063 = vmatprep.subr.bf16.mxu0 %v3576_v25  ;;  %3085 = vmatprep.subr.bf16.mxu1 %v3577_v59 }
 0x2b7   :  { %p3722_p2 = pnand %p3721_p1, %p3715_p12 }
 0x2b9   :  { %3064 = vmatpush3.bf16.msra.mxu0 %v3578_v60  ;;  %3086 = vmatpush3.bf16.msra.mxu1 %v3579_v61 }
 0x2ba   :  { %3065 = vmatprep.subr.bf16.mxu0 %v3580_v62  ;;  %3087 = vmatprep.subr.bf16.mxu1 %v3581_v63 }
 0x2bd   :  { %3066 = vmatpush3.bf16.msra.mxu0 %v3582_v0  ;;  %3088 = vmatpush3.bf16.msra.mxu1 %v3583_v38 }
 0x2be   :  { %3067 = vmatprep.subr.bf16.mxu0 %v3584_v1  ;;  %3089 = vmatprep.subr.bf16.mxu1 %v3585_v2 }
 0x2c1   :  { %3068 = vmatpush3.bf16.msra.mxu0 %v3586_v3  ;;  %3090 = vmatpush3.bf16.msra.mxu1 %v3587_v5 }
 0x2c2   :  { %3069 = vmatprep.subr.bf16.mxu0 %v3588_v40  ;;  %3091 = vmatprep.subr.bf16.mxu1 %v3589_v6 }
 0x2c5   :  { %3070 = vmatpush3.bf16.msra.mxu0 %v3590_v7  ;;  %3092 = vmatpush3.bf16.msra.mxu1 %v3591_v8 }
 0x2c6   :  { %3071 = vmatprep.subr.bf16.mxu0 %v3592_v9  ;;  %3093 = vmatprep.subr.bf16.mxu1 %v3593_v10 }
 0x2c9   :  { %3072 = vmatpush3.bf16.msra.mxu0 %v3594_v11  ;;  %3094 = vmatpush3.bf16.msra.mxu1 %v3595_v12 }
 0x2ca   :  { %3073 = vmatprep.subr.bf16.mxu0 %v3596_v13  ;;  %3095 = vmatprep.subr.bf16.mxu1 %v3597_v14 }
 0x2cd   :  { %3074 = vmatpush3.bf16.msra.mxu0 %v3598_v4  ;;  %3096 = vmatpush3.bf16.msra.mxu1 %v3599_v15 }
 0x2ce   :  { %3075 = vmatprep.subr.bf16.mxu0 %v3600_v16  ;;  %3097 = vmatprep.subr.bf16.mxu1 %v3601_v18 }
 0x2d1   :  { %3076 = vmatpush3.bf16.msra.mxu0 %v3602_v19  ;;  %3098 = vmatpush3.bf16.msra.mxu1 %v3603_v20 }
 0x387   :  { %v2284_v32 = vpop.f32.mrb[8].mxu0  ;;  %v2366_v33 = vpop.f32.mrb[8].mxu1 }
 0x388   :  { %v3109_v34 = vadd.f32 %v2284_v32, %v1556_v28  ;;  %v3111_v35 = vadd.f32 %v2366_v33, %v1564_v29  ;;  %v2286_v36 = vpop.f32.mrb[9].mxu0  ;;  %v2368_v37 = vpop.f32.mrb[9].mxu1 }
 0x389   :  { %v3110_v39 = vadd.f32 %v2286_v36, %v1560_v30  ;;  %v3112_v56 = vadd.f32 %v2368_v37, %v1568_v31  ;;  %v2288_v43 = vpop.f32.mrb[10].mxu0  ;;  %v2370_v42 = vpop.f32.mrb[10].mxu1 }
 0x38a   :  { %v2373_v44 = vmax.f32 %v3109_v34, 0.0  ;;  %v2375_v50 = vmax.f32 %v3111_v35, 0.0  ;;  %v2289_v45 = vpop.f32.mrb[11].mxu0  ;;  %v2371_v46 = vpop.f32.mrb[11].mxu1 }
 0x38b   :  { %v2374_v17 = vmax.f32 %v3110_v39, 0.0  ;;  %v2376_v47 = vmax.f32 %v3112_v56, 0.0 }
 0x38c   :  { %v2377_v51 = vpack.c.bf16 %v2373_v44, %v2373_v44  ;;  %v2379_v52 = vpack.c.bf16 %v2375_v50, %v2375_v50 }
 0x38d   :  { %v2378_v48 = vpack.c.bf16 %v2374_v17, %v2374_v17  ;;  %v2380_v49 = vpack.c.bf16 %v2376_v47, %v2376_v47 }
 0x38f   :  { %2675 = vmatprep.mubr.bf16.mxu0 %v2378_v48  ;;  %2715 = vmatprep.mubr.bf16.mxu1 %v2380_v49 }
 0x390   :  { %2676 = vmatmul.mubr.bf16.vlgmr.msra.gmra.mrb[12].mxu0 %v2377_v51  ;;  %2716 = vmatmul.mubr.bf16.vlgmr.msra.gmra.mrb[12].mxu1 %v2379_v52 }
 0x463   :  { %v3077_v55 = vpop.f32.mrb[12].mxu0  ;;  %v3099_v57 = vpop.f32.mrb[12].mxu1 }
 0x464   :  { %v3078_v25 = vpop.f32.mrb[13].mxu0  ;;  %v3100_v59 = vpop.f32.mrb[13].mxu1 }
 0x465   :  { %v3079_v60 = vadd.f32 %v3078_v25, %v3077_v55  ;;  %v3101_v61 = vadd.f32 %v3100_v59, %v3099_v57  ;;  %v3080_v62 = vpop.f32.mrb[14].mxu0  ;;  %v3102_v63 = vpop.f32.mrb[14].mxu1 }
 0x466   :  { %v3081_v0 = vpop.f32.mrb[15].mxu0  ;;  %v3103_v38 = vpop.f32.mrb[15].mxu1 }
 0x467   :  { %v2678_v1 = vadd.f32 %v3079_v60, %v2450_v58 }
 0x469   :  { %v2718_v2 = vadd.f32 %v3101_v61, %v2678_v1 }
 0x46b   :  { %2723 = vst [vmem:[#allocation11] sm:$0xff] %v2718_v2 }
 0x46c   :  { %3725 = shalt.err (!%p3722_p2)
}
 0x46d   :  { %s3726_s14 = scalar_lea.hbm %s3964_s9, 128 }
 0x46e   :  { %p3727_p3 = scmp.ne.s32.totalorder %s3964_s9, %s3726_s14  ;;  %p3730_p4 = scmp.lt.u32.totalorder %s3726_s14, %s3964_s9 }
 0x470   :  { %p3732_p5 = pnand %p3730_p4, %p3727_p3 }
 0x472   :  { %3735 = shalt.err (!%p3732_p5)
}
 0x473   :  { %2733 = dma.vmem_to_hbm [thread:$0]  %s2731_s13, 128, %s3964_s9, [#allocation4]  }
 0x474   :  { %3742 = dma.done.wait [#allocation4], 128  }
 0x475   :  { %3743 = vsyncadd [#allocation4], 4294967168 }
 0x476   :  { %2737 = vsyncpa [#allocation3], 1 }
 0x477   :  { %2738 = vsyncpa [#allocation6], 1 }
 0x478   :  { %2739 = vsyncpa [#allocation9], 1 }
 0x479   :  { %2740 = vsyncpa [#allocation4], 1 }

</bundles_post_ra>
